<compile_context>
chip_gen: v7x
topology: tpu7x:2x2x1
jax: 0.10.0
libtpu: 0.0.40
codegen_flags: <defaults>
</compile_context>

<pallas_src>
import jax
import jax.numpy as jnp
from jax import lax
from jax.experimental import pallas as pl
from jax.experimental.pallas import tpu as pltpu


def bilstm_kernel(x_ref, wih_ref, b_ref, whhf_ref, whhb_ref,
                  out_ref, hid_ref, xproj_ref):
    """Single invocation runs the full bidirectional recurrence.

    x_ref:     (T*B, E)     VMEM bf16   time-major, flattened
    wih_ref:   (E, 8*Hd)    VMEM bf16   [fwd i,f,o,g | bwd i,f,o,g] columns
    b_ref:     (1, 8*Hd)    VMEM f32    b_ih + b_hh, same column layout
    whhf_ref:  (Hd, 4*Hd)   VMEM bf16   forward recurrent weights, cols [i,f,o,g]
    whhb_ref:  (Hd, 4*Hd)   VMEM bf16   backward recurrent weights
    out_ref:   (T, B, 2*Hd) VMEM f32    fused fwd||bwd output (time-major)
    hid_ref:   (2, B, Hd)   VMEM f32    final forward / backward hidden state
    xproj_ref: (T*B, 8*Hd)  VMEM f32    scratch: hoisted input projection (+bias)
    """
    T, B, H2 = out_ref.shape
    Hd = H2 // 2
    G = 4 * Hd

    # ---- Stage 1: fused, time-independent input projection for both directions ----
    # One big GEMM on the MXU; bias folded in so it disappears from the loop.
    xproj_ref[...] = (
        jnp.dot(x_ref[...], wih_ref[...], preferred_element_type=jnp.float32)
        + b_ref[...])

    # Recurrent weights loaded once (bf16), closed over by the loop body.
    whh_f = whhf_ref[...]
    whh_b = whhb_ref[...]

    def lstm_cell(pre, c):
        # gate column order [i, f, o, g]: one sigmoid over a contiguous 3*Hd slab.
        s = jax.nn.sigmoid(pre[:, :3 * Hd])
        g = jnp.tanh(pre[:, 3 * Hd:])
        i_g = s[:, :Hd]
        f_g = s[:, Hd:2 * Hd]
        o_g = s[:, 2 * Hd:]
        c_new = f_g * c + i_g * g
        h_new = o_g * jnp.tanh(c_new)
        return h_new, c_new

    # ---- Stage 2: serial recurrence, both directions interleaved per step ----
    def step(t, carry):
        h_f, c_f, h_b, c_b = carry
        tf = t
        tb = T - 1 - t

        row_f = xproj_ref[pl.ds(pl.multiple_of(tf * B, B), B), :]   # (B, 8*Hd)
        row_b = xproj_ref[pl.ds(pl.multiple_of(tb * B, B), B), :]
        a_f = row_f[:, :G]          # forward gates at time tf
        a_b = row_b[:, G:]          # backward gates at time tb

        # One fused matmul per direction; the two dots are independent and overlap.
        pre_f = a_f + jnp.dot(h_f.astype(jnp.bfloat16), whh_f,
                              preferred_element_type=jnp.float32)
        pre_b = a_b + jnp.dot(h_b.astype(jnp.bfloat16), whh_b,
                              preferred_element_type=jnp.float32)

        hf_new, cf_new = lstm_cell(pre_f, c_f)
        hb_new, cb_new = lstm_cell(pre_b, c_b)

        # Write straight into the fused output layout (no wrapper concat).
        out_ref[tf, :, :Hd] = hf_new
        out_ref[tb, :, Hd:] = hb_new
        return hf_new, cf_new, hb_new, cb_new

    z = jnp.zeros((B, Hd), jnp.float32)
    unroll = True if T <= 64 else False   # full unroll gives LLO cross-step visibility
    h_f, _, h_b, _ = lax.fori_loop(0, T, step, (z, z, z, z), unroll=unroll)

    hid_ref[0] = h_f
    hid_ref[1] = h_b


@jax.jit
def bilstm_forward(x, wih_cat, b_cat, whh_f, whh_b):
    """x: (B, T, E) batch-first f32.  Returns (output (B,T,2*Hd) f32, hidden (2,B,Hd) f32)."""
    B, T, E = x.shape
    Hd = whh_f.shape[0]

    # Time-major + flattened for the single fused projection GEMM; bf16 halves the
    # HBM traffic of the transposed copy and feeds the MXU natively.
    x2d = jnp.transpose(x, (1, 0, 2)).reshape(T * B, E).astype(jnp.bfloat16)

    def _nbytes(a):
        return a.size * a.dtype.itemsize

    needed = (_nbytes(x2d) + _nbytes(wih_cat) + _nbytes(b_cat)
              + _nbytes(whh_f) + _nbytes(whh_b)
              + T * B * 2 * Hd * 4        # fused output
              + 2 * B * Hd * 4            # final hidden
              + T * B * 8 * Hd * 4)       # xproj scratch
    vmem_limit = int(min(max(2 * needed + (4 << 20), 32 << 20), 64 << 20))

    vmem = pl.BlockSpec(memory_space=pltpu.MemorySpace.VMEM)
    out_tm, hid = pl.pallas_call(
        bilstm_kernel,
        out_shape=(
            jax.ShapeDtypeStruct((T, B, 2 * Hd), jnp.float32),
            jax.ShapeDtypeStruct((2, B, Hd), jnp.float32),
        ),
        in_specs=[vmem] * 5,
        out_specs=(vmem, vmem),
        scratch_shapes=[pltpu.VMEM((T * B, 8 * Hd), jnp.float32)],
        compiler_params=pltpu.CompilerParams(vmem_limit_bytes=vmem_limit),
    )(x2d, wih_cat, b_cat, whh_f, whh_b)

    output = jnp.transpose(out_tm, (1, 0, 2))   # back to batch-first (B, T, 2*Hd)
    return output, hid


def make_params(key, embedding_size, hidden_dim):
    """PyTorch-style U(-1/sqrt(Hd), 1/sqrt(Hd)) init, repacked for the kernel.

    PyTorch stores weight_ih_l0 as (4*Hd, E) with gate row-blocks [i, f, g, o].
    We transpose and reorder columns to [i, f, o, g] (sigmoid gates contiguous),
    concat fwd||bwd input weights into one (E, 8*Hd) matrix, fold b_ih+b_hh into a
    single (1, 8*Hd) bias, and cast the matmul operands to bf16.
    """
    Hd = hidden_dim // 2
    bound = float(Hd) ** -0.5
    keys = jax.random.split(key, 8)
    order = (0, 1, 3, 2)   # PyTorch [i, f, g, o] -> kernel columns [i, f, o, g]

    def u(kk, shape):
        return jax.random.uniform(kk, shape, jnp.float32, -bound, bound)

    def direction(k0, k1, k2, k3):
        w_ih = u(k0, (4 * Hd, embedding_size))
        w_hh = u(k1, (4 * Hd, Hd))
        b_ih = u(k2, (4 * Hd,))
        b_hh = u(k3, (4 * Hd,))
        wih = jnp.concatenate([w_ih[g * Hd:(g + 1) * Hd, :].T for g in order], axis=1)
        whh = jnp.concatenate([w_hh[g * Hd:(g + 1) * Hd, :].T for g in order], axis=1)
        bsum = b_ih + b_hh
        b = jnp.concatenate([bsum[g * Hd:(g + 1) * Hd] for g in order], axis=0)
        return wih, whh, b   # (E,4Hd), (Hd,4Hd), (4Hd,)  all f32, cols [i,f,o,g]

    wih_f, whh_f, b_f = direction(*keys[0:4])
    wih_b, whh_b, b_b = direction(*keys[4:8])

    kernel_params = (
        jnp.concatenate([wih_f, wih_b], axis=1).astype(jnp.bfloat16),       # (E, 8Hd)
        jnp.concatenate([b_f, b_b], axis=0).reshape(1, 8 * Hd),              # (1, 8Hd) f32
        whh_f.astype(jnp.bfloat16),                                          # (Hd, 4Hd)
        whh_b.astype(jnp.bfloat16),                                          # (Hd, 4Hd)
    )
    ref_params = ((wih_f, whh_f, b_f), (wih_b, whh_b, b_b))
    return kernel_params, ref_params


def lstm_ref(x, wih, whh, b, reverse):
    """Pure-JAX f32 reference (lax.scan) for one direction, gate columns [i,f,o,g]."""
    B, T, _ = x.shape
    Hd = whh.shape[0]
    xs = jnp.transpose(x, (1, 0, 2))
    if reverse:
        xs = xs[::-1]

    def step(carry, x_t):
        h, c = carry
        pre = x_t @ wih + h @ whh + b
        i = jax.nn.sigmoid(pre[:, :Hd])
        f = jax.nn.sigmoid(pre[:, Hd:2 * Hd])
        o = jax.nn.sigmoid(pre[:, 2 * Hd:3 * Hd])
        g = jnp.tanh(pre[:, 3 * Hd:])
        c = f * c + i * g
        h = o * jnp.tanh(c)
        return (h, c), h

    (h_fin, _), hs = lax.scan(step, (jnp.zeros((B, Hd)), jnp.zeros((B, Hd))), xs)
    if reverse:
        hs = hs[::-1]
    return jnp.transpose(hs, (1, 0, 2)), h_fin


if __name__ == "__main__":
    # Small shapes consistent with the module (embedding_size=E, hidden_dim=2*Hd).
    B, T, E, hidden_dim = 2, 8, 32, 32
    Hd = hidden_dim // 2
    key = jax.random.PRNGKey(0)
    k_x, k_p = jax.random.split(key)

    x = jax.random.normal(k_x, (B, T, E), jnp.float32)
    kparams, rparams = make_params(k_p, E, hidden_dim)

    output, hidden = bilstm_forward(x, *kparams)
    jax.block_until_ready((output, hidden))

    # Sanity check against an f32 pure-JAX reference of the same recurrence.
    (wih_f, whh_f, b_f), (wih_b, whh_b, b_b) = rparams
    out_f_ref, h_f_ref = lstm_ref(x, wih_f, whh_f, b_f, reverse=False)
    out_b_ref, h_b_ref = lstm_ref(x, wih_b, whh_b, b_b, reverse=True)
    output_ref = jnp.concatenate([out_f_ref, out_b_ref], axis=-1)
    hidden_ref = jnp.stack([h_f_ref, h_b_ref], axis=0)

    assert output.shape == (B, T, hidden_dim)
    assert hidden.shape == (2, B, Hd)
    # bf16 MXU operands in the kernel vs f32 reference -> relaxed tolerance.
    assert jnp.allclose(output, output_ref, atol=5e-2, rtol=5e-2), \
        float(jnp.max(jnp.abs(output - output_ref)))
    assert jnp.allclose(hidden, hidden_ref, atol=5e-2, rtol=5e-2), \
        float(jnp.max(jnp.abs(hidden - hidden_ref)))

    print("KERNEL_OK")
</pallas_src>

<mosaic_0001>
module attributes {stable_mosaic.version = 11 : i64} {
  func.func @bilstm_kernel(%arg0: memref<16x32xbf16, #tpu.memory_space<vmem>>, %arg1: memref<32x128xbf16, #tpu.memory_space<vmem>>, %arg2: memref<1x128xf32, #tpu.memory_space<vmem>>, %arg3: memref<16x64xbf16, #tpu.memory_space<vmem>>, %arg4: memref<16x64xbf16, #tpu.memory_space<vmem>>, %arg5: memref<8x2x32xf32, #tpu.memory_space<vmem>>, %arg6: memref<2x2x16xf32, #tpu.memory_space<vmem>>, %arg7: memref<16x128xf32, #tpu.memory_space<vmem>>) attributes {dimension_semantics = [], scalar_prefetch = 0 : i64, scratch_operands = 1 : i64, tpu.core_type = #tpu.core_type<tc>} {
    %c0 = arith.constant 0 : index
    %c0_0 = arith.constant 0 : index
    %0 = vector.load %arg0[%c0, %c0_0] : memref<16x32xbf16, #tpu.memory_space<vmem>>, vector<16x32xbf16>
    %c0_1 = arith.constant 0 : index
    %c0_2 = arith.constant 0 : index
    %1 = vector.load %arg1[%c0_1, %c0_2] : memref<32x128xbf16, #tpu.memory_space<vmem>>, vector<32x128xbf16>
    %cst = arith.constant dense<0.000000e+00> : vector<16x128xf32>
    %2 = tpu.matmul %0, %1, %cst {dimension_numbers = #tpu.dot_dimension_numbers<[1], [0], [0], [1], [0, 0, 1, 1], [], []>} : vector<16x32xbf16>, vector<32x128xbf16>, vector<16x128xf32> -> vector<16x128xf32>
    %c0_3 = arith.constant 0 : index
    %c0_4 = arith.constant 0 : index
    %3 = vector.load %arg2[%c0_3, %c0_4] : memref<1x128xf32, #tpu.memory_space<vmem>>, vector<1x128xf32>
    %4 = vector.broadcast %3 : vector<1x128xf32> to vector<16x128xf32>
    %5 = arith.addf %2, %4 : vector<16x128xf32>
    %c0_5 = arith.constant 0 : index
    %c0_6 = arith.constant 0 : index
    %6 = vector.load %arg7[%c0_5, %c0_6] : memref<16x128xf32, #tpu.memory_space<vmem>>, vector<16x128xf32>
    tpu.vector_store %arg7[%c0_5, %c0_6], %5 {strides = array<i32>} : memref<16x128xf32, #tpu.memory_space<vmem>>, vector<16x128xf32>,
    %c0_7 = arith.constant 0 : index
    %c0_8 = arith.constant 0 : index
    %7 = vector.load %arg3[%c0_7, %c0_8] : memref<16x64xbf16, #tpu.memory_space<vmem>>, vector<16x64xbf16>
    %c0_9 = arith.constant 0 : index
    %c0_10 = arith.constant 0 : index
    %8 = vector.load %arg4[%c0_9, %c0_10] : memref<16x64xbf16, #tpu.memory_space<vmem>>, vector<16x64xbf16>
    %cst_11 = arith.constant 0.000000e+00 : f32
    %9 = vector.broadcast %cst_11 : f32 to vector<2x16xf32>
    %c0_i32 = arith.constant 0 : i32
    %c7_i32 = arith.constant 7 : i32
    %10 = arith.subi %c7_i32, %c0_i32 : i32
    %c2_i32 = arith.constant 2 : i32
    %11 = arith.muli %c0_i32, %c2_i32 : i32
    %12 = tpu.assume_multiple %11, 2 : i32
    %13 = arith.index_cast %12 : i32 to index
    %c0_12 = arith.constant 0 : index
    %14 = vector.load %arg7[%13, %c0_12] : memref<16x128xf32, #tpu.memory_space<vmem>>, vector<2x128xf32>
    %c2_i32_13 = arith.constant 2 : i32
    %15 = arith.muli %10, %c2_i32_13 : i32
    %16 = tpu.assume_multiple %15, 2 : i32
    %17 = arith.index_cast %16 : i32 to index
    %c0_14 = arith.constant 0 : index
    %18 = vector.load %arg7[%17, %c0_14] : memref<16x128xf32, #tpu.memory_space<vmem>>, vector<2x128xf32>
    %19 = vector.extract_strided_slice %14 {offsets = [0, 0], sizes = [2, 64], strides = [1, 1]} : vector<2x128xf32> to vector<2x64xf32>
    %20 = vector.extract_strided_slice %18 {offsets = [0, 64], sizes = [2, 64], strides = [1, 1]} : vector<2x128xf32> to vector<2x64xf32>
    %21 = arith.truncf %9 : vector<2x16xf32> to vector<2x16xbf16>
    %cst_15 = arith.constant dense<0.000000e+00> : vector<2x64xf32>
    %22 = tpu.matmul %21, %7, %cst_15 {dimension_numbers = #tpu.dot_dimension_numbers<[1], [0], [0], [1], [0, 0, 1, 1], [], []>} : vector<2x16xbf16>, vector<16x64xbf16>, vector<2x64xf32> -> vector<2x64xf32>
    %23 = arith.addf %19, %22 : vector<2x64xf32>
    %24 = arith.truncf %9 : vector<2x16xf32> to vector<2x16xbf16>
    %cst_16 = arith.constant dense<0.000000e+00> : vector<2x64xf32>
    %25 = tpu.matmul %24, %8, %cst_16 {dimension_numbers = #tpu.dot_dimension_numbers<[1], [0], [0], [1], [0, 0, 1, 1], [], []>} : vector<2x16xbf16>, vector<16x64xbf16>, vector<2x64xf32> -> vector<2x64xf32>
    %26 = arith.addf %20, %25 : vector<2x64xf32>
    %27 = vector.extract_strided_slice %23 {offsets = [0, 0], sizes = [2, 48], strides = [1, 1]} : vector<2x64xf32> to vector<2x48xf32>
    %28 = arith.negf %27 : vector<2x48xf32>
    %29 = math.exp %28 : vector<2x48xf32>
    %cst_17 = arith.constant 1.000000e+00 : f32
    %30 = vector.broadcast %cst_17 : f32 to vector<2x48xf32>
    %31 = arith.addf %30, %29 : vector<2x48xf32>
    %32 = arith.divf %30, %31 : vector<2x48xf32>
    %33 = vector.extract_strided_slice %23 {offsets = [0, 48], sizes = [2, 16], strides = [1, 1]} : vector<2x64xf32> to vector<2x16xf32>
    %34 = math.tanh %33 : vector<2x16xf32>
    %35 = vector.extract_strided_slice %32 {offsets = [0, 0], sizes = [2, 16], strides = [1, 1]} : vector<2x48xf32> to vector<2x16xf32>
    %36 = vector.extract_strided_slice %32 {offsets = [0, 16], sizes = [2, 16], strides = [1, 1]} : vector<2x48xf32> to vector<2x16xf32>
    %37 = vector.extract_strided_slice %32 {offsets = [0, 32], sizes = [2, 16], strides = [1, 1]} : vector<2x48xf32> to vector<2x16xf32>
    %38 = arith.mulf %36, %9 : vector<2x16xf32>
    %39 = arith.mulf %35, %34 : vector<2x16xf32>
    %40 = arith.addf %38, %39 : vector<2x16xf32>
    %41 = math.tanh %40 : vector<2x16xf32>
    %42 = arith.mulf %37, %41 : vector<2x16xf32>
    %43 = vector.extract_strided_slice %26 {offsets = [0, 0], sizes = [2, 48], strides = [1, 1]} : vector<2x64xf32> to vector<2x48xf32>
    %44 = arith.negf %43 : vector<2x48xf32>
    %45 = math.exp %44 : vector<2x48xf32>
    %cst_18 = arith.constant 1.000000e+00 : f32
    %46 = vector.broadcast %cst_18 : f32 to vector<2x48xf32>
    %47 = arith.addf %46, %45 : vector<2x48xf32>
    %48 = arith.divf %46, %47 : vector<2x48xf32>
    %49 = vector.extract_strided_slice %26 {offsets = [0, 48], sizes = [2, 16], strides = [1, 1]} : vector<2x64xf32> to vector<2x16xf32>
    %50 = math.tanh %49 : vector<2x16xf32>
    %51 = vector.extract_strided_slice %48 {offsets = [0, 0], sizes = [2, 16], strides = [1, 1]} : vector<2x48xf32> to vector<2x16xf32>
    %52 = vector.extract_strided_slice %48 {offsets = [0, 16], sizes = [2, 16], strides = [1, 1]} : vector<2x48xf32> to vector<2x16xf32>
    %53 = vector.extract_strided_slice %48 {offsets = [0, 32], sizes = [2, 16], strides = [1, 1]} : vector<2x48xf32> to vector<2x16xf32>
    %54 = arith.mulf %52, %9 : vector<2x16xf32>
    %55 = arith.mulf %51, %50 : vector<2x16xf32>
    %56 = arith.addf %54, %55 : vector<2x16xf32>
    %57 = math.tanh %56 : vector<2x16xf32>
    %58 = arith.mulf %53, %57 : vector<2x16xf32>
    %59 = arith.index_cast %c0_i32 : i32 to index
    %c0_19 = arith.constant 0 : index
    %c0_20 = arith.constant 0 : index
    %60 = vector.load %arg5[%59, %c0_19, %c0_20] : memref<8x2x32xf32, #tpu.memory_space<vmem>>, vector<1x2x16xf32>
    %61 = vector.shape_cast %60 : vector<1x2x16xf32> to vector<2x16xf32>
    %62 = vector.shape_cast %42 : vector<2x16xf32> to vector<1x2x16xf32>
    tpu.vector_store %arg5[%59, %c0_19, %c0_20], %62 {strides = array<i32>} : memref<8x2x32xf32, #tpu.memory_space<vmem>>, vector<1x2x16xf32>,
    %63 = arith.index_cast %10 : i32 to index
    %c0_21 = arith.constant 0 : index
    %c16 = arith.constant 16 : index
    %64 = vector.load %arg5[%63, %c0_21, %c16] : memref<8x2x32xf32, #tpu.memory_space<vmem>>, vector<1x2x16xf32>
    %65 = vector.shape_cast %64 : vector<1x2x16xf32> to vector<2x16xf32>
    %66 = vector.shape_cast %58 : vector<2x16xf32> to vector<1x2x16xf32>
    tpu.vector_store %arg5[%63, %c0_21, %c16], %66 {strides = array<i32>} : memref<8x2x32xf32, #tpu.memory_space<vmem>>, vector<1x2x16xf32>,
    %c1_i32 = arith.constant 1 : i32
    %c7_i32_22 = arith.constant 7 : i32
    %67 = arith.subi %c7_i32_22, %c1_i32 : i32
    %c2_i32_23 = arith.constant 2 : i32
    %68 = arith.muli %c1_i32, %c2_i32_23 : i32
    %69 = tpu.assume_multiple %68, 2 : i32
    %70 = arith.index_cast %69 : i32 to index
    %c0_24 = arith.constant 0 : index
    %71 = vector.load %arg7[%70, %c0_24] : memref<16x128xf32, #tpu.memory_space<vmem>>, vector<2x128xf32>
    %c2_i32_25 = arith.constant 2 : i32
    %72 = arith.muli %67, %c2_i32_25 : i32
    %73 = tpu.assume_multiple %72, 2 : i32
    %74 = arith.index_cast %73 : i32 to index
    %c0_26 = arith.constant 0 : index
    %75 = vector.load %arg7[%74, %c0_26] : memref<16x128xf32, #tpu.memory_space<vmem>>, vector<2x128xf32>
    %76 = vector.extract_strided_slice %71 {offsets = [0, 0], sizes = [2, 64], strides = [1, 1]} : vector<2x128xf32> to vector<2x64xf32>
    %77 = vector.extract_strided_slice %75 {offsets = [0, 64], sizes = [2, 64], strides = [1, 1]} : vector<2x128xf32> to vector<2x64xf32>
    %78 = arith.truncf %42 : vector<2x16xf32> to vector<2x16xbf16>
    %cst_27 = arith.constant dense<0.000000e+00> : vector<2x64xf32>
    %79 = tpu.matmul %78, %7, %cst_27 {dimension_numbers = #tpu.dot_dimension_numbers<[1], [0], [0], [1], [0, 0, 1, 1], [], []>} : vector<2x16xbf16>, vector<16x64xbf16>, vector<2x64xf32> -> vector<2x64xf32>
    %80 = arith.addf %76, %79 : vector<2x64xf32>
    %81 = arith.truncf %58 : vector<2x16xf32> to vector<2x16xbf16>
    %cst_28 = arith.constant dense<0.000000e+00> : vector<2x64xf32>
    %82 = tpu.matmul %81, %8, %cst_28 {dimension_numbers = #tpu.dot_dimension_numbers<[1], [0], [0], [1], [0, 0, 1, 1], [], []>} : vector<2x16xbf16>, vector<16x64xbf16>, vector<2x64xf32> -> vector<2x64xf32>
    %83 = arith.addf %77, %82 : vector<2x64xf32>
    %84 = vector.extract_strided_slice %80 {offsets = [0, 0], sizes = [2, 48], strides = [1, 1]} : vector<2x64xf32> to vector<2x48xf32>
    %85 = arith.negf %84 : vector<2x48xf32>
    %86 = math.exp %85 : vector<2x48xf32>
    %cst_29 = arith.constant 1.000000e+00 : f32
    %87 = vector.broadcast %cst_29 : f32 to vector<2x48xf32>
    %88 = arith.addf %87, %86 : vector<2x48xf32>
    %89 = arith.divf %87, %88 : vector<2x48xf32>
    %90 = vector.extract_strided_slice %80 {offsets = [0, 48], sizes = [2, 16], strides = [1, 1]} : vector<2x64xf32> to vector<2x16xf32>
    %91 = math.tanh %90 : vector<2x16xf32>
    %92 = vector.extract_strided_slice %89 {offsets = [0, 0], sizes = [2, 16], strides = [1, 1]} : vector<2x48xf32> to vector<2x16xf32>
    %93 = vector.extract_strided_slice %89 {offsets = [0, 16], sizes = [2, 16], strides = [1, 1]} : vector<2x48xf32> to vector<2x16xf32>
    %94 = vector.extract_strided_slice %89 {offsets = [0, 32], sizes = [2, 16], strides = [1, 1]} : vector<2x48xf32> to vector<2x16xf32>
    %95 = arith.mulf %93, %40 : vector<2x16xf32>
    %96 = arith.mulf %92, %91 : vector<2x16xf32>
    %97 = arith.addf %95, %96 : vector<2x16xf32>
    %98 = math.tanh %97 : vector<2x16xf32>
    %99 = arith.mulf %94, %98 : vector<2x16xf32>
    %100 = vector.extract_strided_slice %83 {offsets = [0, 0], sizes = [2, 48], strides = [1, 1]} : vector<2x64xf32> to vector<2x48xf32>
    %101 = arith.negf %100 : vector<2x48xf32>
    %102 = math.exp %101 : vector<2x48xf32>
    %cst_30 = arith.constant 1.000000e+00 : f32
    %103 = vector.broadcast %cst_30 : f32 to vector<2x48xf32>
    %104 = arith.addf %103, %102 : vector<2x48xf32>
    %105 = arith.divf %103, %104 : vector<2x48xf32>
    %106 = vector.extract_strided_slice %83 {offsets = [0, 48], sizes = [2, 16], strides = [1, 1]} : vector<2x64xf32> to vector<2x16xf32>
    %107 = math.tanh %106 : vector<2x16xf32>
    %108 = vector.extract_strided_slice %105 {offsets = [0, 0], sizes = [2, 16], strides = [1, 1]} : vector<2x48xf32> to vector<2x16xf32>
    %109 = vector.extract_strided_slice %105 {offsets = [0, 16], sizes = [2, 16], strides = [1, 1]} : vector<2x48xf32> to vector<2x16xf32>
    %110 = vector.extract_strided_slice %105 {offsets = [0, 32], sizes = [2, 16], strides = [1, 1]} : vector<2x48xf32> to vector<2x16xf32>
    %111 = arith.mulf %109, %56 : vector<2x16xf32>
    %112 = arith.mulf %108, %107 : vector<2x16xf32>
    %113 = arith.addf %111, %112 : vector<2x16xf32>
    %114 = math.tanh %113 : vector<2x16xf32>
    %115 = arith.mulf %110, %114 : vector<2x16xf32>
    %116 = arith.index_cast %c1_i32 : i32 to index
    %c0_31 = arith.constant 0 : index
    %c0_32 = arith.constant 0 : index
    %117 = vector.load %arg5[%116, %c0_31, %c0_32] : memref<8x2x32xf32, #tpu.memory_space<vmem>>, vector<1x2x16xf32>
    %118 = vector.shape_cast %117 : vector<1x2x16xf32> to vector<2x16xf32>
    %119 = vector.shape_cast %99 : vector<2x16xf32> to vector<1x2x16xf32>
    tpu.vector_store %arg5[%116, %c0_31, %c0_32], %119 {strides = array<i32>} : memref<8x2x32xf32, #tpu.memory_space<vmem>>, vector<1x2x16xf32>,
    %120 = arith.index_cast %67 : i32 to index
    %c0_33 = arith.constant 0 : index
    %c16_34 = arith.constant 16 : index
    %121 = vector.load %arg5[%120, %c0_33, %c16_34] : memref<8x2x32xf32, #tpu.memory_space<vmem>>, vector<1x2x16xf32>
    %122 = vector.shape_cast %121 : vector<1x2x16xf32> to vector<2x16xf32>
    %123 = vector.shape_cast %115 : vector<2x16xf32> to vector<1x2x16xf32>
    tpu.vector_store %arg5[%120, %c0_33, %c16_34], %123 {strides = array<i32>} : memref<8x2x32xf32, #tpu.memory_space<vmem>>, vector<1x2x16xf32>,
    %c2_i32_35 = arith.constant 2 : i32
    %c7_i32_36 = arith.constant 7 : i32
    %124 = arith.subi %c7_i32_36, %c2_i32_35 : i32
    %c2_i32_37 = arith.constant 2 : i32
    %125 = arith.muli %c2_i32_35, %c2_i32_37 : i32
    %126 = tpu.assume_multiple %125, 2 : i32
    %127 = arith.index_cast %126 : i32 to index
    %c0_38 = arith.constant 0 : index
    %128 = vector.load %arg7[%127, %c0_38] : memref<16x128xf32, #tpu.memory_space<vmem>>, vector<2x128xf32>
    %c2_i32_39 = arith.constant 2 : i32
    %129 = arith.muli %124, %c2_i32_39 : i32
    %130 = tpu.assume_multiple %129, 2 : i32
    %131 = arith.index_cast %130 : i32 to index
    %c0_40 = arith.constant 0 : index
    %132 = vector.load %arg7[%131, %c0_40] : memref<16x128xf32, #tpu.memory_space<vmem>>, vector<2x128xf32>
    %133 = vector.extract_strided_slice %128 {offsets = [0, 0], sizes = [2, 64], strides = [1, 1]} : vector<2x128xf32> to vector<2x64xf32>
    %134 = vector.extract_strided_slice %132 {offsets = [0, 64], sizes = [2, 64], strides = [1, 1]} : vector<2x128xf32> to vector<2x64xf32>
    %135 = arith.truncf %99 : vector<2x16xf32> to vector<2x16xbf16>
    %cst_41 = arith.constant dense<0.000000e+00> : vector<2x64xf32>
    %136 = tpu.matmul %135, %7, %cst_41 {dimension_numbers = #tpu.dot_dimension_numbers<[1], [0], [0], [1], [0, 0, 1, 1], [], []>} : vector<2x16xbf16>, vector<16x64xbf16>, vector<2x64xf32> -> vector<2x64xf32>
    %137 = arith.addf %133, %136 : vector<2x64xf32>
    %138 = arith.truncf %115 : vector<2x16xf32> to vector<2x16xbf16>
    %cst_42 = arith.constant dense<0.000000e+00> : vector<2x64xf32>
    %139 = tpu.matmul %138, %8, %cst_42 {dimension_numbers = #tpu.dot_dimension_numbers<[1], [0], [0], [1], [0, 0, 1, 1], [], []>} : vector<2x16xbf16>, vector<16x64xbf16>, vector<2x64xf32> -> vector<2x64xf32>
    %140 = arith.addf %134, %139 : vector<2x64xf32>
    %141 = vector.extract_strided_slice %137 {offsets = [0, 0], sizes = [2, 48], strides = [1, 1]} : vector<2x64xf32> to vector<2x48xf32>
    %142 = arith.negf %141 : vector<2x48xf32>
    %143 = math.exp %142 : vector<2x48xf32>
    %cst_43 = arith.constant 1.000000e+00 : f32
    %144 = vector.broadcast %cst_43 : f32 to vector<2x48xf32>
    %145 = arith.addf %144, %143 : vector<2x48xf32>
    %146 = arith.divf %144, %145 : vector<2x48xf32>
    %147 = vector.extract_strided_slice %137 {offsets = [0, 48], sizes = [2, 16], strides = [1, 1]} : vector<2x64xf32> to vector<2x16xf32>
    %148 = math.tanh %147 : vector<2x16xf32>
    %149 = vector.extract_strided_slice %146 {offsets = [0, 0], sizes = [2, 16], strides = [1, 1]} : vector<2x48xf32> to vector<2x16xf32>
    %150 = vector.extract_strided_slice %146 {offsets = [0, 16], sizes = [2, 16], strides = [1, 1]} : vector<2x48xf32> to vector<2x16xf32>
    %151 = vector.extract_strided_slice %146 {offsets = [0, 32], sizes = [2, 16], strides = [1, 1]} : vector<2x48xf32> to vector<2x16xf32>
    %152 = arith.mulf %150, %97 : vector<2x16xf32>
    %153 = arith.mulf %149, %148 : vector<2x16xf32>
    %154 = arith.addf %152, %153 : vector<2x16xf32>
    %155 = math.tanh %154 : vector<2x16xf32>
    %156 = arith.mulf %151, %155 : vector<2x16xf32>
    %157 = vector.extract_strided_slice %140 {offsets = [0, 0], sizes = [2, 48], strides = [1, 1]} : vector<2x64xf32> to vector<2x48xf32>
    %158 = arith.negf %157 : vector<2x48xf32>
    %159 = math.exp %158 : vector<2x48xf32>
    %cst_44 = arith.constant 1.000000e+00 : f32
    %160 = vector.broadcast %cst_44 : f32 to vector<2x48xf32>
    %161 = arith.addf %160, %159 : vector<2x48xf32>
    %162 = arith.divf %160, %161 : vector<2x48xf32>
    %163 = vector.extract_strided_slice %140 {offsets = [0, 48], sizes = [2, 16], strides = [1, 1]} : vector<2x64xf32> to vector<2x16xf32>
    %164 = math.tanh %163 : vector<2x16xf32>
    %165 = vector.extract_strided_slice %162 {offsets = [0, 0], sizes = [2, 16], strides = [1, 1]} : vector<2x48xf32> to vector<2x16xf32>
    %166 = vector.extract_strided_slice %162 {offsets = [0, 16], sizes = [2, 16], strides = [1, 1]} : vector<2x48xf32> to vector<2x16xf32>
    %167 = vector.extract_strided_slice %162 {offsets = [0, 32], sizes = [2, 16], strides = [1, 1]} : vector<2x48xf32> to vector<2x16xf32>
    %168 = arith.mulf %166, %113 : vector<2x16xf32>
    %169 = arith.mulf %165, %164 : vector<2x16xf32>
    %170 = arith.addf %168, %169 : vector<2x16xf32>
    %171 = math.tanh %170 : vector<2x16xf32>
    %172 = arith.mulf %167, %171 : vector<2x16xf32>
    %173 = arith.index_cast %c2_i32_35 : i32 to index
    %c0_45 = arith.constant 0 : index
    %c0_46 = arith.constant 0 : index
    %174 = vector.load %arg5[%173, %c0_45, %c0_46] : memref<8x2x32xf32, #tpu.memory_space<vmem>>, vector<1x2x16xf32>
    %175 = vector.shape_cast %174 : vector<1x2x16xf32> to vector<2x16xf32>
    %176 = vector.shape_cast %156 : vector<2x16xf32> to vector<1x2x16xf32>
    tpu.vector_store %arg5[%173, %c0_45, %c0_46], %176 {strides = array<i32>} : memref<8x2x32xf32, #tpu.memory_space<vmem>>, vector<1x2x16xf32>,
    %177 = arith.index_cast %124 : i32 to index
    %c0_47 = arith.constant 0 : index
    %c16_48 = arith.constant 16 : index
    %178 = vector.load %arg5[%177, %c0_47, %c16_48] : memref<8x2x32xf32, #tpu.memory_space<vmem>>, vector<1x2x16xf32>
    %179 = vector.shape_cast %178 : vector<1x2x16xf32> to vector<2x16xf32>
    %180 = vector.shape_cast %172 : vector<2x16xf32> to vector<1x2x16xf32>
    tpu.vector_store %arg5[%177, %c0_47, %c16_48], %180 {strides = array<i32>} : memref<8x2x32xf32, #tpu.memory_space<vmem>>, vector<1x2x16xf32>,
    %c3_i32 = arith.constant 3 : i32
    %c7_i32_49 = arith.constant 7 : i32
    %181 = arith.subi %c7_i32_49, %c3_i32 : i32
    %c2_i32_50 = arith.constant 2 : i32
    %182 = arith.muli %c3_i32, %c2_i32_50 : i32
    %183 = tpu.assume_multiple %182, 2 : i32
    %184 = arith.index_cast %183 : i32 to index
    %c0_51 = arith.constant 0 : index
    %185 = vector.load %arg7[%184, %c0_51] : memref<16x128xf32, #tpu.memory_space<vmem>>, vector<2x128xf32>
    %c2_i32_52 = arith.constant 2 : i32
    %186 = arith.muli %181, %c2_i32_52 : i32
    %187 = tpu.assume_multiple %186, 2 : i32
    %188 = arith.index_cast %187 : i32 to index
    %c0_53 = arith.constant 0 : index
    %189 = vector.load %arg7[%188, %c0_53] : memref<16x128xf32, #tpu.memory_space<vmem>>, vector<2x128xf32>
    %190 = vector.extract_strided_slice %185 {offsets = [0, 0], sizes = [2, 64], strides = [1, 1]} : vector<2x128xf32> to vector<2x64xf32>
    %191 = vector.extract_strided_slice %189 {offsets = [0, 64], sizes = [2, 64], strides = [1, 1]} : vector<2x128xf32> to vector<2x64xf32>
    %192 = arith.truncf %156 : vector<2x16xf32> to vector<2x16xbf16>
    %cst_54 = arith.constant dense<0.000000e+00> : vector<2x64xf32>
    %193 = tpu.matmul %192, %7, %cst_54 {dimension_numbers = #tpu.dot_dimension_numbers<[1], [0], [0], [1], [0, 0, 1, 1], [], []>} : vector<2x16xbf16>, vector<16x64xbf16>, vector<2x64xf32> -> vector<2x64xf32>
    %194 = arith.addf %190, %193 : vector<2x64xf32>
    %195 = arith.truncf %172 : vector<2x16xf32> to vector<2x16xbf16>
    %cst_55 = arith.constant dense<0.000000e+00> : vector<2x64xf32>
    %196 = tpu.matmul %195, %8, %cst_55 {dimension_numbers = #tpu.dot_dimension_numbers<[1], [0], [0], [1], [0, 0, 1, 1], [], []>} : vector<2x16xbf16>, vector<16x64xbf16>, vector<2x64xf32> -> vector<2x64xf32>
    %197 = arith.addf %191, %196 : vector<2x64xf32>
    %198 = vector.extract_strided_slice %194 {offsets = [0, 0], sizes = [2, 48], strides = [1, 1]} : vector<2x64xf32> to vector<2x48xf32>
    %199 = arith.negf %198 : vector<2x48xf32>
    %200 = math.exp %199 : vector<2x48xf32>
    %cst_56 = arith.constant 1.000000e+00 : f32
    %201 = vector.broadcast %cst_56 : f32 to vector<2x48xf32>
    %202 = arith.addf %201, %200 : vector<2x48xf32>
    %203 = arith.divf %201, %202 : vector<2x48xf32>
    %204 = vector.extract_strided_slice %194 {offsets = [0, 48], sizes = [2, 16], strides = [1, 1]} : vector<2x64xf32> to vector<2x16xf32>
    %205 = math.tanh %204 : vector<2x16xf32>
    %206 = vector.extract_strided_slice %203 {offsets = [0, 0], sizes = [2, 16], strides = [1, 1]} : vector<2x48xf32> to vector<2x16xf32>
    %207 = vector.extract_strided_slice %203 {offsets = [0, 16], sizes = [2, 16], strides = [1, 1]} : vector<2x48xf32> to vector<2x16xf32>
    %208 = vector.extract_strided_slice %203 {offsets = [0, 32], sizes = [2, 16], strides = [1, 1]} : vector<2x48xf32> to vector<2x16xf32>
    %209 = arith.mulf %207, %154 : vector<2x16xf32>
    %210 = arith.mulf %206, %205 : vector<2x16xf32>
    %211 = arith.addf %209, %210 : vector<2x16xf32>
    %212 = math.tanh %211 : vector<2x16xf32>
    %213 = arith.mulf %208, %212 : vector<2x16xf32>
    %214 = vector.extract_strided_slice %197 {offsets = [0, 0], sizes = [2, 48], strides = [1, 1]} : vector<2x64xf32> to vector<2x48xf32>
    %215 = arith.negf %214 : vector<2x48xf32>
    %216 = math.exp %215 : vector<2x48xf32>
    %cst_57 = arith.constant 1.000000e+00 : f32
    %217 = vector.broadcast %cst_57 : f32 to vector<2x48xf32>
    %218 = arith.addf %217, %216 : vector<2x48xf32>
    %219 = arith.divf %217, %218 : vector<2x48xf32>
    %220 = vector.extract_strided_slice %197 {offsets = [0, 48], sizes = [2, 16], strides = [1, 1]} : vector<2x64xf32> to vector<2x16xf32>
    %221 = math.tanh %220 : vector<2x16xf32>
    %222 = vector.extract_strided_slice %219 {offsets = [0, 0], sizes = [2, 16], strides = [1, 1]} : vector<2x48xf32> to vector<2x16xf32>
    %223 = vector.extract_strided_slice %219 {offsets = [0, 16], sizes = [2, 16], strides = [1, 1]} : vector<2x48xf32> to vector<2x16xf32>
    %224 = vector.extract_strided_slice %219 {offsets = [0, 32], sizes = [2, 16], strides = [1, 1]} : vector<2x48xf32> to vector<2x16xf32>
    %225 = arith.mulf %223, %170 : vector<2x16xf32>
    %226 = arith.mulf %222, %221 : vector<2x16xf32>
    %227 = arith.addf %225, %226 : vector<2x16xf32>
    %228 = math.tanh %227 : vector<2x16xf32>
    %229 = arith.mulf %224, %228 : vector<2x16xf32>
    %230 = arith.index_cast %c3_i32 : i32 to index
    %c0_58 = arith.constant 0 : index
    %c0_59 = arith.constant 0 : index
    %231 = vector.load %arg5[%230, %c0_58, %c0_59] : memref<8x2x32xf32, #tpu.memory_space<vmem>>, vector<1x2x16xf32>
    %232 = vector.shape_cast %231 : vector<1x2x16xf32> to vector<2x16xf32>
    %233 = vector.shape_cast %213 : vector<2x16xf32> to vector<1x2x16xf32>
    tpu.vector_store %arg5[%230, %c0_58, %c0_59], %233 {strides = array<i32>} : memref<8x2x32xf32, #tpu.memory_space<vmem>>, vector<1x2x16xf32>,
    %234 = arith.index_cast %181 : i32 to index
    %c0_60 = arith.constant 0 : index
    %c16_61 = arith.constant 16 : index
    %235 = vector.load %arg5[%234, %c0_60, %c16_61] : memref<8x2x32xf32, #tpu.memory_space<vmem>>, vector<1x2x16xf32>
    %236 = vector.shape_cast %235 : vector<1x2x16xf32> to vector<2x16xf32>
    %237 = vector.shape_cast %229 : vector<2x16xf32> to vector<1x2x16xf32>
    tpu.vector_store %arg5[%234, %c0_60, %c16_61], %237 {strides = array<i32>} : memref<8x2x32xf32, #tpu.memory_space<vmem>>, vector<1x2x16xf32>,
    %c4_i32 = arith.constant 4 : i32
    %c7_i32_62 = arith.constant 7 : i32
    %238 = arith.subi %c7_i32_62, %c4_i32 : i32
    %c2_i32_63 = arith.constant 2 : i32
    %239 = arith.muli %c4_i32, %c2_i32_63 : i32
    %240 = tpu.assume_multiple %239, 2 : i32
    %241 = arith.index_cast %240 : i32 to index
    %c0_64 = arith.constant 0 : index
    %242 = vector.load %arg7[%241, %c0_64] : memref<16x128xf32, #tpu.memory_space<vmem>>, vector<2x128xf32>
    %c2_i32_65 = arith.constant 2 : i32
    %243 = arith.muli %238, %c2_i32_65 : i32
    %244 = tpu.assume_multiple %243, 2 : i32
    %245 = arith.index_cast %244 : i32 to index
    %c0_66 = arith.constant 0 : index
    %246 = vector.load %arg7[%245, %c0_66] : memref<16x128xf32, #tpu.memory_space<vmem>>, vector<2x128xf32>
    %247 = vector.extract_strided_slice %242 {offsets = [0, 0], sizes = [2, 64], strides = [1, 1]} : vector<2x128xf32> to vector<2x64xf32>
    %248 = vector.extract_strided_slice %246 {offsets = [0, 64], sizes = [2, 64], strides = [1, 1]} : vector<2x128xf32> to vector<2x64xf32>
    %249 = arith.truncf %213 : vector<2x16xf32> to vector<2x16xbf16>
    %cst_67 = arith.constant dense<0.000000e+00> : vector<2x64xf32>
    %250 = tpu.matmul %249, %7, %cst_67 {dimension_numbers = #tpu.dot_dimension_numbers<[1], [0], [0], [1], [0, 0, 1, 1], [], []>} : vector<2x16xbf16>, vector<16x64xbf16>, vector<2x64xf32> -> vector<2x64xf32>
    %251 = arith.addf %247, %250 : vector<2x64xf32>
    %252 = arith.truncf %229 : vector<2x16xf32> to vector<2x16xbf16>
    %cst_68 = arith.constant dense<0.000000e+00> : vector<2x64xf32>
    %253 = tpu.matmul %252, %8, %cst_68 {dimension_numbers = #tpu.dot_dimension_numbers<[1], [0], [0], [1], [0, 0, 1, 1], [], []>} : vector<2x16xbf16>, vector<16x64xbf16>, vector<2x64xf32> -> vector<2x64xf32>
    %254 = arith.addf %248, %253 : vector<2x64xf32>
    %255 = vector.extract_strided_slice %251 {offsets = [0, 0], sizes = [2, 48], strides = [1, 1]} : vector<2x64xf32> to vector<2x48xf32>
    %256 = arith.negf %255 : vector<2x48xf32>
    %257 = math.exp %256 : vector<2x48xf32>
    %cst_69 = arith.constant 1.000000e+00 : f32
    %258 = vector.broadcast %cst_69 : f32 to vector<2x48xf32>
    %259 = arith.addf %258, %257 : vector<2x48xf32>
    %260 = arith.divf %258, %259 : vector<2x48xf32>
    %261 = vector.extract_strided_slice %251 {offsets = [0, 48], sizes = [2, 16], strides = [1, 1]} : vector<2x64xf32> to vector<2x16xf32>
    %262 = math.tanh %261 : vector<2x16xf32>
    %263 = vector.extract_strided_slice %260 {offsets = [0, 0], sizes = [2, 16], strides = [1, 1]} : vector<2x48xf32> to vector<2x16xf32>
    %264 = vector.extract_strided_slice %260 {offsets = [0, 16], sizes = [2, 16], strides = [1, 1]} : vector<2x48xf32> to vector<2x16xf32>
    %265 = vector.extract_strided_slice %260 {offsets = [0, 32], sizes = [2, 16], strides = [1, 1]} : vector<2x48xf32> to vector<2x16xf32>
    %266 = arith.mulf %264, %211 : vector<2x16xf32>
    %267 = arith.mulf %263, %262 : vector<2x16xf32>
    %268 = arith.addf %266, %267 : vector<2x16xf32>
    %269 = math.tanh %268 : vector<2x16xf32>
    %270 = arith.mulf %265, %269 : vector<2x16xf32>
    %271 = vector.extract_strided_slice %254 {offsets = [0, 0], sizes = [2, 48], strides = [1, 1]} : vector<2x64xf32> to vector<2x48xf32>
    %272 = arith.negf %271 : vector<2x48xf32>
    %273 = math.exp %272 : vector<2x48xf32>
    %cst_70 = arith.constant 1.000000e+00 : f32
    %274 = vector.broadcast %cst_70 : f32 to vector<2x48xf32>
    %275 = arith.addf %274, %273 : vector<2x48xf32>
    %276 = arith.divf %274, %275 : vector<2x48xf32>
    %277 = vector.extract_strided_slice %254 {offsets = [0, 48], sizes = [2, 16], strides = [1, 1]} : vector<2x64xf32> to vector<2x16xf32>
    %278 = math.tanh %277 : vector<2x16xf32>
    %279 = vector.extract_strided_slice %276 {offsets = [0, 0], sizes = [2, 16], strides = [1, 1]} : vector<2x48xf32> to vector<2x16xf32>
    %280 = vector.extract_strided_slice %276 {offsets = [0, 16], sizes = [2, 16], strides = [1, 1]} : vector<2x48xf32> to vector<2x16xf32>
    %281 = vector.extract_strided_slice %276 {offsets = [0, 32], sizes = [2, 16], strides = [1, 1]} : vector<2x48xf32> to vector<2x16xf32>
    %282 = arith.mulf %280, %227 : vector<2x16xf32>
    %283 = arith.mulf %279, %278 : vector<2x16xf32>
    %284 = arith.addf %282, %283 : vector<2x16xf32>
    %285 = math.tanh %284 : vector<2x16xf32>
    %286 = arith.mulf %281, %285 : vector<2x16xf32>
    %287 = arith.index_cast %c4_i32 : i32 to index
    %c0_71 = arith.constant 0 : index
    %c0_72 = arith.constant 0 : index
    %288 = vector.load %arg5[%287, %c0_71, %c0_72] : memref<8x2x32xf32, #tpu.memory_space<vmem>>, vector<1x2x16xf32>
    %289 = vector.shape_cast %288 : vector<1x2x16xf32> to vector<2x16xf32>
    %290 = vector.shape_cast %270 : vector<2x16xf32> to vector<1x2x16xf32>
    tpu.vector_store %arg5[%287, %c0_71, %c0_72], %290 {strides = array<i32>} : memref<8x2x32xf32, #tpu.memory_space<vmem>>, vector<1x2x16xf32>,
    %291 = arith.index_cast %238 : i32 to index
    %c0_73 = arith.constant 0 : index
    %c16_74 = arith.constant 16 : index
    %292 = vector.load %arg5[%291, %c0_73, %c16_74] : memref<8x2x32xf32, #tpu.memory_space<vmem>>, vector<1x2x16xf32>
    %293 = vector.shape_cast %292 : vector<1x2x16xf32> to vector<2x16xf32>
    %294 = vector.shape_cast %286 : vector<2x16xf32> to vector<1x2x16xf32>
    tpu.vector_store %arg5[%291, %c0_73, %c16_74], %294 {strides = array<i32>} : memref<8x2x32xf32, #tpu.memory_space<vmem>>, vector<1x2x16xf32>,
    %c5_i32 = arith.constant 5 : i32
    %c7_i32_75 = arith.constant 7 : i32
    %295 = arith.subi %c7_i32_75, %c5_i32 : i32
    %c2_i32_76 = arith.constant 2 : i32
    %296 = arith.muli %c5_i32, %c2_i32_76 : i32
    %297 = tpu.assume_multiple %296, 2 : i32
    %298 = arith.index_cast %297 : i32 to index
    %c0_77 = arith.constant 0 : index
    %299 = vector.load %arg7[%298, %c0_77] : memref<16x128xf32, #tpu.memory_space<vmem>>, vector<2x128xf32>
    %c2_i32_78 = arith.constant 2 : i32
    %300 = arith.muli %295, %c2_i32_78 : i32
    %301 = tpu.assume_multiple %300, 2 : i32
    %302 = arith.index_cast %301 : i32 to index
    %c0_79 = arith.constant 0 : index
    %303 = vector.load %arg7[%302, %c0_79] : memref<16x128xf32, #tpu.memory_space<vmem>>, vector<2x128xf32>
    %304 = vector.extract_strided_slice %299 {offsets = [0, 0], sizes = [2, 64], strides = [1, 1]} : vector<2x128xf32> to vector<2x64xf32>
    %305 = vector.extract_strided_slice %303 {offsets = [0, 64], sizes = [2, 64], strides = [1, 1]} : vector<2x128xf32> to vector<2x64xf32>
    %306 = arith.truncf %270 : vector<2x16xf32> to vector<2x16xbf16>
    %cst_80 = arith.constant dense<0.000000e+00> : vector<2x64xf32>
    %307 = tpu.matmul %306, %7, %cst_80 {dimension_numbers = #tpu.dot_dimension_numbers<[1], [0], [0], [1], [0, 0, 1, 1], [], []>} : vector<2x16xbf16>, vector<16x64xbf16>, vector<2x64xf32> -> vector<2x64xf32>
    %308 = arith.addf %304, %307 : vector<2x64xf32>
    %309 = arith.truncf %286 : vector<2x16xf32> to vector<2x16xbf16>
    %cst_81 = arith.constant dense<0.000000e+00> : vector<2x64xf32>
    %310 = tpu.matmul %309, %8, %cst_81 {dimension_numbers = #tpu.dot_dimension_numbers<[1], [0], [0], [1], [0, 0, 1, 1], [], []>} : vector<2x16xbf16>, vector<16x64xbf16>, vector<2x64xf32> -> vector<2x64xf32>
    %311 = arith.addf %305, %310 : vector<2x64xf32>
    %312 = vector.extract_strided_slice %308 {offsets = [0, 0], sizes = [2, 48], strides = [1, 1]} : vector<2x64xf32> to vector<2x48xf32>
    %313 = arith.negf %312 : vector<2x48xf32>
    %314 = math.exp %313 : vector<2x48xf32>
    %cst_82 = arith.constant 1.000000e+00 : f32
    %315 = vector.broadcast %cst_82 : f32 to vector<2x48xf32>
    %316 = arith.addf %315, %314 : vector<2x48xf32>
    %317 = arith.divf %315, %316 : vector<2x48xf32>
    %318 = vector.extract_strided_slice %308 {offsets = [0, 48], sizes = [2, 16], strides = [1, 1]} : vector<2x64xf32> to vector<2x16xf32>
    %319 = math.tanh %318 : vector<2x16xf32>
    %320 = vector.extract_strided_slice %317 {offsets = [0, 0], sizes = [2, 16], strides = [1, 1]} : vector<2x48xf32> to vector<2x16xf32>
    %321 = vector.extract_strided_slice %317 {offsets = [0, 16], sizes = [2, 16], strides = [1, 1]} : vector<2x48xf32> to vector<2x16xf32>
    %322 = vector.extract_strided_slice %317 {offsets = [0, 32], sizes = [2, 16], strides = [1, 1]} : vector<2x48xf32> to vector<2x16xf32>
    %323 = arith.mulf %321, %268 : vector<2x16xf32>
    %324 = arith.mulf %320, %319 : vector<2x16xf32>
    %325 = arith.addf %323, %324 : vector<2x16xf32>
    %326 = math.tanh %325 : vector<2x16xf32>
    %327 = arith.mulf %322, %326 : vector<2x16xf32>
    %328 = vector.extract_strided_slice %311 {offsets = [0, 0], sizes = [2, 48], strides = [1, 1]} : vector<2x64xf32> to vector<2x48xf32>
    %329 = arith.negf %328 : vector<2x48xf32>
    %330 = math.exp %329 : vector<2x48xf32>
    %cst_83 = arith.constant 1.000000e+00 : f32
    %331 = vector.broadcast %cst_83 : f32 to vector<2x48xf32>
    %332 = arith.addf %331, %330 : vector<2x48xf32>
    %333 = arith.divf %331, %332 : vector<2x48xf32>
    %334 = vector.extract_strided_slice %311 {offsets = [0, 48], sizes = [2, 16], strides = [1, 1]} : vector<2x64xf32> to vector<2x16xf32>
    %335 = math.tanh %334 : vector<2x16xf32>
    %336 = vector.extract_strided_slice %333 {offsets = [0, 0], sizes = [2, 16], strides = [1, 1]} : vector<2x48xf32> to vector<2x16xf32>
    %337 = vector.extract_strided_slice %333 {offsets = [0, 16], sizes = [2, 16], strides = [1, 1]} : vector<2x48xf32> to vector<2x16xf32>
    %338 = vector.extract_strided_slice %333 {offsets = [0, 32], sizes = [2, 16], strides = [1, 1]} : vector<2x48xf32> to vector<2x16xf32>
    %339 = arith.mulf %337, %284 : vector<2x16xf32>
    %340 = arith.mulf %336, %335 : vector<2x16xf32>
    %341 = arith.addf %339, %340 : vector<2x16xf32>
    %342 = math.tanh %341 : vector<2x16xf32>
    %343 = arith.mulf %338, %342 : vector<2x16xf32>
    %344 = arith.index_cast %c5_i32 : i32 to index
    %c0_84 = arith.constant 0 : index
    %c0_85 = arith.constant 0 : index
    %345 = vector.load %arg5[%344, %c0_84, %c0_85] : memref<8x2x32xf32, #tpu.memory_space<vmem>>, vector<1x2x16xf32>
    %346 = vector.shape_cast %345 : vector<1x2x16xf32> to vector<2x16xf32>
    %347 = vector.shape_cast %327 : vector<2x16xf32> to vector<1x2x16xf32>
    tpu.vector_store %arg5[%344, %c0_84, %c0_85], %347 {strides = array<i32>} : memref<8x2x32xf32, #tpu.memory_space<vmem>>, vector<1x2x16xf32>,
    %348 = arith.index_cast %295 : i32 to index
    %c0_86 = arith.constant 0 : index
    %c16_87 = arith.constant 16 : index
    %349 = vector.load %arg5[%348, %c0_86, %c16_87] : memref<8x2x32xf32, #tpu.memory_space<vmem>>, vector<1x2x16xf32>
    %350 = vector.shape_cast %349 : vector<1x2x16xf32> to vector<2x16xf32>
    %351 = vector.shape_cast %343 : vector<2x16xf32> to vector<1x2x16xf32>
    tpu.vector_store %arg5[%348, %c0_86, %c16_87], %351 {strides = array<i32>} : memref<8x2x32xf32, #tpu.memory_space<vmem>>, vector<1x2x16xf32>,
    %c6_i32 = arith.constant 6 : i32
    %c7_i32_88 = arith.constant 7 : i32
    %352 = arith.subi %c7_i32_88, %c6_i32 : i32
    %c2_i32_89 = arith.constant 2 : i32
    %353 = arith.muli %c6_i32, %c2_i32_89 : i32
    %354 = tpu.assume_multiple %353, 2 : i32
    %355 = arith.index_cast %354 : i32 to index
    %c0_90 = arith.constant 0 : index
    %356 = vector.load %arg7[%355, %c0_90] : memref<16x128xf32, #tpu.memory_space<vmem>>, vector<2x128xf32>
    %c2_i32_91 = arith.constant 2 : i32
    %357 = arith.muli %352, %c2_i32_91 : i32
    %358 = tpu.assume_multiple %357, 2 : i32
    %359 = arith.index_cast %358 : i32 to index
    %c0_92 = arith.constant 0 : index
    %360 = vector.load %arg7[%359, %c0_92] : memref<16x128xf32, #tpu.memory_space<vmem>>, vector<2x128xf32>
    %361 = vector.extract_strided_slice %356 {offsets = [0, 0], sizes = [2, 64], strides = [1, 1]} : vector<2x128xf32> to vector<2x64xf32>
    %362 = vector.extract_strided_slice %360 {offsets = [0, 64], sizes = [2, 64], strides = [1, 1]} : vector<2x128xf32> to vector<2x64xf32>
    %363 = arith.truncf %327 : vector<2x16xf32> to vector<2x16xbf16>
    %cst_93 = arith.constant dense<0.000000e+00> : vector<2x64xf32>
    %364 = tpu.matmul %363, %7, %cst_93 {dimension_numbers = #tpu.dot_dimension_numbers<[1], [0], [0], [1], [0, 0, 1, 1], [], []>} : vector<2x16xbf16>, vector<16x64xbf16>, vector<2x64xf32> -> vector<2x64xf32>
    %365 = arith.addf %361, %364 : vector<2x64xf32>
    %366 = arith.truncf %343 : vector<2x16xf32> to vector<2x16xbf16>
    %cst_94 = arith.constant dense<0.000000e+00> : vector<2x64xf32>
    %367 = tpu.matmul %366, %8, %cst_94 {dimension_numbers = #tpu.dot_dimension_numbers<[1], [0], [0], [1], [0, 0, 1, 1], [], []>} : vector<2x16xbf16>, vector<16x64xbf16>, vector<2x64xf32> -> vector<2x64xf32>
    %368 = arith.addf %362, %367 : vector<2x64xf32>
    %369 = vector.extract_strided_slice %365 {offsets = [0, 0], sizes = [2, 48], strides = [1, 1]} : vector<2x64xf32> to vector<2x48xf32>
    %370 = arith.negf %369 : vector<2x48xf32>
    %371 = math.exp %370 : vector<2x48xf32>
    %cst_95 = arith.constant 1.000000e+00 : f32
    %372 = vector.broadcast %cst_95 : f32 to vector<2x48xf32>
    %373 = arith.addf %372, %371 : vector<2x48xf32>
    %374 = arith.divf %372, %373 : vector<2x48xf32>
    %375 = vector.extract_strided_slice %365 {offsets = [0, 48], sizes = [2, 16], strides = [1, 1]} : vector<2x64xf32> to vector<2x16xf32>
    %376 = math.tanh %375 : vector<2x16xf32>
    %377 = vector.extract_strided_slice %374 {offsets = [0, 0], sizes = [2, 16], strides = [1, 1]} : vector<2x48xf32> to vector<2x16xf32>
    %378 = vector.extract_strided_slice %374 {offsets = [0, 16], sizes = [2, 16], strides = [1, 1]} : vector<2x48xf32> to vector<2x16xf32>
    %379 = vector.extract_strided_slice %374 {offsets = [0, 32], sizes = [2, 16], strides = [1, 1]} : vector<2x48xf32> to vector<2x16xf32>
    %380 = arith.mulf %378, %325 : vector<2x16xf32>
    %381 = arith.mulf %377, %376 : vector<2x16xf32>
    %382 = arith.addf %380, %381 : vector<2x16xf32>
    %383 = math.tanh %382 : vector<2x16xf32>
    %384 = arith.mulf %379, %383 : vector<2x16xf32>
    %385 = vector.extract_strided_slice %368 {offsets = [0, 0], sizes = [2, 48], strides = [1, 1]} : vector<2x64xf32> to vector<2x48xf32>
    %386 = arith.negf %385 : vector<2x48xf32>
    %387 = math.exp %386 : vector<2x48xf32>
    %cst_96 = arith.constant 1.000000e+00 : f32
    %388 = vector.broadcast %cst_96 : f32 to vector<2x48xf32>
    %389 = arith.addf %388, %387 : vector<2x48xf32>
    %390 = arith.divf %388, %389 : vector<2x48xf32>
    %391 = vector.extract_strided_slice %368 {offsets = [0, 48], sizes = [2, 16], strides = [1, 1]} : vector<2x64xf32> to vector<2x16xf32>
    %392 = math.tanh %391 : vector<2x16xf32>
    %393 = vector.extract_strided_slice %390 {offsets = [0, 0], sizes = [2, 16], strides = [1, 1]} : vector<2x48xf32> to vector<2x16xf32>
    %394 = vector.extract_strided_slice %390 {offsets = [0, 16], sizes = [2, 16], strides = [1, 1]} : vector<2x48xf32> to vector<2x16xf32>
    %395 = vector.extract_strided_slice %390 {offsets = [0, 32], sizes = [2, 16], strides = [1, 1]} : vector<2x48xf32> to vector<2x16xf32>
    %396 = arith.mulf %394, %341 : vector<2x16xf32>
    %397 = arith.mulf %393, %392 : vector<2x16xf32>
    %398 = arith.addf %396, %397 : vector<2x16xf32>
    %399 = math.tanh %398 : vector<2x16xf32>
    %400 = arith.mulf %395, %399 : vector<2x16xf32>
    %401 = arith.index_cast %c6_i32 : i32 to index
    %c0_97 = arith.constant 0 : index
    %c0_98 = arith.constant 0 : index
    %402 = vector.load %arg5[%401, %c0_97, %c0_98] : memref<8x2x32xf32, #tpu.memory_space<vmem>>, vector<1x2x16xf32>
    %403 = vector.shape_cast %402 : vector<1x2x16xf32> to vector<2x16xf32>
    %404 = vector.shape_cast %384 : vector<2x16xf32> to vector<1x2x16xf32>
    tpu.vector_store %arg5[%401, %c0_97, %c0_98], %404 {strides = array<i32>} : memref<8x2x32xf32, #tpu.memory_space<vmem>>, vector<1x2x16xf32>,
    %405 = arith.index_cast %352 : i32 to index
    %c0_99 = arith.constant 0 : index
    %c16_100 = arith.constant 16 : index
    %406 = vector.load %arg5[%405, %c0_99, %c16_100] : memref<8x2x32xf32, #tpu.memory_space<vmem>>, vector<1x2x16xf32>
    %407 = vector.shape_cast %406 : vector<1x2x16xf32> to vector<2x16xf32>
    %408 = vector.shape_cast %400 : vector<2x16xf32> to vector<1x2x16xf32>
    tpu.vector_store %arg5[%405, %c0_99, %c16_100], %408 {strides = array<i32>} : memref<8x2x32xf32, #tpu.memory_space<vmem>>, vector<1x2x16xf32>,
    %c7_i32_101 = arith.constant 7 : i32
    %c7_i32_102 = arith.constant 7 : i32
    %409 = arith.subi %c7_i32_102, %c7_i32_101 : i32
    %c2_i32_103 = arith.constant 2 : i32
    %410 = arith.muli %c7_i32_101, %c2_i32_103 : i32
    %411 = tpu.assume_multiple %410, 2 : i32
    %412 = arith.index_cast %411 : i32 to index
    %c0_104 = arith.constant 0 : index
    %413 = vector.load %arg7[%412, %c0_104] : memref<16x128xf32, #tpu.memory_space<vmem>>, vector<2x128xf32>
    %c2_i32_105 = arith.constant 2 : i32
    %414 = arith.muli %409, %c2_i32_105 : i32
    %415 = tpu.assume_multiple %414, 2 : i32
    %416 = arith.index_cast %415 : i32 to index
    %c0_106 = arith.constant 0 : index
    %417 = vector.load %arg7[%416, %c0_106] : memref<16x128xf32, #tpu.memory_space<vmem>>, vector<2x128xf32>
    %418 = vector.extract_strided_slice %413 {offsets = [0, 0], sizes = [2, 64], strides = [1, 1]} : vector<2x128xf32> to vector<2x64xf32>
    %419 = vector.extract_strided_slice %417 {offsets = [0, 64], sizes = [2, 64], strides = [1, 1]} : vector<2x128xf32> to vector<2x64xf32>
    %420 = arith.truncf %384 : vector<2x16xf32> to vector<2x16xbf16>
    %cst_107 = arith.constant dense<0.000000e+00> : vector<2x64xf32>
    %421 = tpu.matmul %420, %7, %cst_107 {dimension_numbers = #tpu.dot_dimension_numbers<[1], [0], [0], [1], [0, 0, 1, 1], [], []>} : vector<2x16xbf16>, vector<16x64xbf16>, vector<2x64xf32> -> vector<2x64xf32>
    %422 = arith.addf %418, %421 : vector<2x64xf32>
    %423 = arith.truncf %400 : vector<2x16xf32> to vector<2x16xbf16>
    %cst_108 = arith.constant dense<0.000000e+00> : vector<2x64xf32>
    %424 = tpu.matmul %423, %8, %cst_108 {dimension_numbers = #tpu.dot_dimension_numbers<[1], [0], [0], [1], [0, 0, 1, 1], [], []>} : vector<2x16xbf16>, vector<16x64xbf16>, vector<2x64xf32> -> vector<2x64xf32>
    %425 = arith.addf %419, %424 : vector<2x64xf32>
    %426 = vector.extract_strided_slice %422 {offsets = [0, 0], sizes = [2, 48], strides = [1, 1]} : vector<2x64xf32> to vector<2x48xf32>
    %427 = arith.negf %426 : vector<2x48xf32>
    %428 = math.exp %427 : vector<2x48xf32>
    %cst_109 = arith.constant 1.000000e+00 : f32
    %429 = vector.broadcast %cst_109 : f32 to vector<2x48xf32>
    %430 = arith.addf %429, %428 : vector<2x48xf32>
    %431 = arith.divf %429, %430 : vector<2x48xf32>
    %432 = vector.extract_strided_slice %422 {offsets = [0, 48], sizes = [2, 16], strides = [1, 1]} : vector<2x64xf32> to vector<2x16xf32>
    %433 = math.tanh %432 : vector<2x16xf32>
    %434 = vector.extract_strided_slice %431 {offsets = [0, 0], sizes = [2, 16], strides = [1, 1]} : vector<2x48xf32> to vector<2x16xf32>
    %435 = vector.extract_strided_slice %431 {offsets = [0, 16], sizes = [2, 16], strides = [1, 1]} : vector<2x48xf32> to vector<2x16xf32>
    %436 = vector.extract_strided_slice %431 {offsets = [0, 32], sizes = [2, 16], strides = [1, 1]} : vector<2x48xf32> to vector<2x16xf32>
    %437 = arith.mulf %435, %382 : vector<2x16xf32>
    %438 = arith.mulf %434, %433 : vector<2x16xf32>
    %439 = arith.addf %437, %438 : vector<2x16xf32>
    %440 = math.tanh %439 : vector<2x16xf32>
    %441 = arith.mulf %436, %440 : vector<2x16xf32>
    %442 = vector.extract_strided_slice %425 {offsets = [0, 0], sizes = [2, 48], strides = [1, 1]} : vector<2x64xf32> to vector<2x48xf32>
    %443 = arith.negf %442 : vector<2x48xf32>
    %444 = math.exp %443 : vector<2x48xf32>
    %cst_110 = arith.constant 1.000000e+00 : f32
    %445 = vector.broadcast %cst_110 : f32 to vector<2x48xf32>
    %446 = arith.addf %445, %444 : vector<2x48xf32>
    %447 = arith.divf %445, %446 : vector<2x48xf32>
    %448 = vector.extract_strided_slice %425 {offsets = [0, 48], sizes = [2, 16], strides = [1, 1]} : vector<2x64xf32> to vector<2x16xf32>
    %449 = math.tanh %448 : vector<2x16xf32>
    %450 = vector.extract_strided_slice %447 {offsets = [0, 0], sizes = [2, 16], strides = [1, 1]} : vector<2x48xf32> to vector<2x16xf32>
    %451 = vector.extract_strided_slice %447 {offsets = [0, 16], sizes = [2, 16], strides = [1, 1]} : vector<2x48xf32> to vector<2x16xf32>
    %452 = vector.extract_strided_slice %447 {offsets = [0, 32], sizes = [2, 16], strides = [1, 1]} : vector<2x48xf32> to vector<2x16xf32>
    %453 = arith.mulf %451, %398 : vector<2x16xf32>
    %454 = arith.mulf %450, %449 : vector<2x16xf32>
    %455 = arith.addf %453, %454 : vector<2x16xf32>
    %456 = math.tanh %455 : vector<2x16xf32>
    %457 = arith.mulf %452, %456 : vector<2x16xf32>
    %458 = arith.index_cast %c7_i32_101 : i32 to index
    %c0_111 = arith.constant 0 : index
    %c0_112 = arith.constant 0 : index
    %459 = vector.load %arg5[%458, %c0_111, %c0_112] : memref<8x2x32xf32, #tpu.memory_space<vmem>>, vector<1x2x16xf32>
    %460 = vector.shape_cast %459 : vector<1x2x16xf32> to vector<2x16xf32>
    %461 = vector.shape_cast %441 : vector<2x16xf32> to vector<1x2x16xf32>
    tpu.vector_store %arg5[%458, %c0_111, %c0_112], %461 {strides = array<i32>} : memref<8x2x32xf32, #tpu.memory_space<vmem>>, vector<1x2x16xf32>,
    %462 = arith.index_cast %409 : i32 to index
    %c0_113 = arith.constant 0 : index
    %c16_114 = arith.constant 16 : index
    %463 = vector.load %arg5[%462, %c0_113, %c16_114] : memref<8x2x32xf32, #tpu.memory_space<vmem>>, vector<1x2x16xf32>
    %464 = vector.shape_cast %463 : vector<1x2x16xf32> to vector<2x16xf32>
    %465 = vector.shape_cast %457 : vector<2x16xf32> to vector<1x2x16xf32>
    tpu.vector_store %arg5[%462, %c0_113, %c16_114], %465 {strides = array<i32>} : memref<8x2x32xf32, #tpu.memory_space<vmem>>, vector<1x2x16xf32>,
    %c8_i32 = arith.constant 8 : i32
    %c0_115 = arith.constant 0 : index
    %c0_116 = arith.constant 0 : index
    %c0_117 = arith.constant 0 : index
    %466 = vector.load %arg6[%c0_115, %c0_116, %c0_117] : memref<2x2x16xf32, #tpu.memory_space<vmem>>, vector<1x2x16xf32>
    %467 = vector.shape_cast %466 : vector<1x2x16xf32> to vector<2x16xf32>
    %468 = vector.shape_cast %441 : vector<2x16xf32> to vector<1x2x16xf32>
    tpu.vector_store %arg6[%c0_115, %c0_116, %c0_117], %468 {strides = array<i32>} : memref<2x2x16xf32, #tpu.memory_space<vmem>>, vector<1x2x16xf32>,
    %c1 = arith.constant 1 : index
    %c0_118 = arith.constant 0 : index
    %c0_119 = arith.constant 0 : index
    %469 = vector.load %arg6[%c1, %c0_118, %c0_119] : memref<2x2x16xf32, #tpu.memory_space<vmem>>, vector<1x2x16xf32>
    %470 = vector.shape_cast %469 : vector<1x2x16xf32> to vector<2x16xf32>
    %471 = vector.shape_cast %457 : vector<2x16xf32> to vector<1x2x16xf32>
    tpu.vector_store %arg6[%c1, %c0_118, %c0_119], %471 {strides = array<i32>} : memref<2x2x16xf32, #tpu.memory_space<vmem>>, vector<1x2x16xf32>,
    return
  }
}

</mosaic_0001>

<bundles_post_ra>
// kernel: bilstm_forward.1
= control target key start
LH: loop header
LB: loop body
LE: loop exit
PB: predicated region body
PF: predicated region fallthrough
CT: control target
= control target key end

     0   :  { %v1787_v1 = vmov 0.0   ;;  %vm1788_vm0 = vmmov 0   ;;  %s2206_s0 = inlined_call_operand.vmem [shape: bf16[16,32], index: 0, kind: input, shape index: {}]   ;;  %s2207_s1 = inlined_call_operand.vmem [shape: bf16[32,128], index: 1, kind: input, shape index: {}]   ;;  %s2208_s2 = inlined_call_operand.vmem [shape: f32[1,128], index: 2, kind: input, shape index: {}]   ;;  %s2209_s3 = inlined_call_operand.vmem [shape: bf16[16,64], index: 3, kind: input, shape index: {}]   ;;  %s2210_s4 = inlined_call_operand.vmem [shape: bf16[16,64], index: 4, kind: input, shape index: {}]   ;;  %s2211_s5 = inlined_call_operand.vmem [shape: f32[8,2,32], index: 5, kind: output, shape index: {0}]   ;;  %s2212_s6 = inlined_call_operand.hbm [shape: f32[2,2,16], index: 6, kind: output, shape index: {1}]  }
   0x1   :  { %v1630_v0 = vld [vmem:[%s2207_s1] sm:$0xff]   ;;  %1515 = vmatprep.subr.bf16.mxu0 %v1787_v1  ;;  %1523 = vmatprep.subr.bf16.mxu1 %v1787_v1  ;;  %v1632_v3 = vld [vmem:[%s2207_s1 + $0x8] sm:$0xff]  }
   0x2   :  { %v1841_v2 = vld [vmem:[%s2209_s3] sm:$0xff]   ;;  %1516 = vmatpush3.bf16.msra.mxu0 %v1630_v0  ;;  %1525 = vmatprep.mubr.msk.bf16.mxu1 %vm1788_vm0, %v1787_v1 }
   0x3   :  { %1524 = vmatpush3.bf16.msra.mxu1 %v1841_v2  ;;  %1517 = vmatprep.subr.bf16.mxu0 %v1787_v1  ;;  %v1853_v4 = vld [vmem:[%s2210_s4] sm:$0xff]  }
   0x4   :  { %1529 = vmatprep.subr.bf16.mxu1 %v1787_v1  ;;  %1519 = vmatprep.mubr.msk.bf16.mxu0 %vm1788_vm0, %v1787_v1  ;;  %v1634_v5 = vld [vmem:[%s2206_s0] sm:$0xff]  }
   0x5   :  { %12 = vsyncpa [#allocation4], 0  ;;  %v1789_v6 = vmov 0   ;;  %vm54_vm1 = vcmask 261120   ;;  %v1429_v9 = vld [vmem:[%s2208_s2] ss:$0 sm:$0xff] }
   0x6   :  { %1526 = vmatmul.mubr.bf16.vlgmr.msra.gmra.mrb[0].mxu1 %v1789_v6  ;;  %1518 = vmatpush3.bf16.msra.mxu0 %v1632_v3  ;;  %s1790_s4 = smov 64   ;;  %s1791_s2 = smov 80   ;;  %vm114_vm2 = vcmask 130048   ;;  %vm262_vm3 = vcmask 123904   ;;  %vm269_vm4 = vcmask 255104  }
   0x7   :  { %1530 = vmatpush3.bf16.msra.mxu1 %v1853_v4  ;;  %1531 = vmatprep.mubr.msk.bf16.mxu1 %vm1788_vm0, %v1787_v1  ;;  %s1792_s30 = smov 16   ;;  %s1793_s7 = smov 32  }
   0x8   :  { %1541 = vmatprep.subr.bf16.mxu1 %v1787_v1  ;;  %1535 = vmatprep.subr.bf16.mxu0 %v1787_v1  ;;  %s1794_s8 = smov 96   ;;  %s1795_s17 = smov 48  }
   0x9   :  { %1520 = vmatmul.mubr.msk.bf16.vlgmr.msra.gmra.mrb[0].mxu0 %vm54_vm1, %v1634_v5  ;;  %s1796_s10 = smov [#allocation3]  }
   0xa   :  { %1536 = vmatpush3.bf16.msra.mxu0 %v1841_v2  ;;  %1537 = vmatprep.mubr.msk.bf16.mxu0 %vm1788_vm0, %v1787_v1  ;;  %s1416_s11 = sshll.u32 %s1796_s10, 4  ;;  %s1417_s11 = int_to_ptr.vmem [resolvable:$true] %s1416_s11 }
   0xb   :  { %1547 = vmatprep.subr.bf16.mxu0 %v1787_v1  ;;  %s1763_s14 = scalar_lea.vmem %s1417_s11, 64  ;;  %p1768_p1 = scmp.lt.s32.totalorder %s1417_s11, %s1417_s11 }
   0xc   :  { %p1764_p0 = scmp.ne.s32.totalorder %s1417_s11, %s1763_s14  ;;  %p1769_p2 = scmp.lt.s32.totalorder %s1763_s14, %s1763_s14 }
   0xe   :  { %1532 = vmatmul.mubr.bf16.vlgmr.msra.gmra.mrb[4].mxu1 %v1789_v6  ;;  %p1770_p3 = por %p1769_p2, %p1768_p1 }
   0xf   :  { %1542 = vmatpush3.bf16.msra.mxu1 %v1853_v4  ;;  %1543 = vmatprep.mubr.msk.bf16.mxu1 %vm1788_vm0, %v1787_v1 }
  0x10   :  { %1553 = vmatprep.subr.bf16.mxu1 %v1787_v1  ;;  %p1771_p4 = pnand %p1770_p3, %p1764_p0 }
  0xd9   :  { %v152_v7 = vpop.f32.mrb[0].mxu1 }
  0xda   :  { %v1527_v8 = vpop.f32.mrb[1].mxu1 }
  0xdb   :  { %v155_v10 = vpop.f32.mrb[2].mxu1 }
  0xdc   :  { %v1528_v11 = vpop.f32.mrb[3].mxu1  ;;  %v92_v12 = vpop.f32.mrb[0].mxu0 }
  0xdd   :  { %v93_v13 = vadd.f32 %v1429_v9, %v92_v12  ;;  %v1521_v14 = vpop.f32.mrb[1].mxu0 }
  0xde   :  { %v95_v15 = vpop.f32.mrb[2].mxu0 }
  0xdf   :  { %99 = vst [vmem:[#allocation2] sm:$0xff] %v93_v13  ;;  %v96_v16 = vadd.f32 %v1429_v9, %v95_v15  ;;  %v1522_v17 = vpop.f32.mrb[3].mxu0 }
  0xe1   :  { %v199_v18 = vpop.f32.mrb[4].mxu1  ;;  %100 = vst [vmem:[#allocation2 + $0x8] sm:$0xff] %v96_v16 }
  0xe2   :  { %206 = vrot.lane.b32.xlu0 %v199_v18, %s1790_s4  ;;  %v1533_v19 = vpop.f32.mrb[5].mxu1 }
  0xe3   :  { %v202_v20 = vpop.f32.mrb[6].mxu1 }
  0xe4   :  { %v1534_v21 = vpop.f32.mrb[7].mxu1 }
  0xe6   :  { %v105_v34 = vld [vmem:[#allocation2] sm:$0x3]  ;;  %v272_v17 = vld [vmem:[#allocation2 + $0x2] sm:$0x3] }
  0xe7   :  { %v158_v36 = vadd.f32 %v152_v7, %v105_v34 }
  0xe8   :  { %v107_v23 = vld [vmem:[#allocation2 + $0xe] sm:$0x3]  ;;  %v274_v61 = vld [vmem:[#allocation2 + $0xc] sm:$0x3] }
  0xe9   :  { %v1436_v39 = vmul.f32 -1.442695, %v158_v36 }
 0x154   :  { %v207_v22 = vpop.permute.xlu0 %206 }
 0x155   :  { %v209_v24 = vadd.f32 %v207_v22, %v107_v23 }
 0x157   :  { %1635 = vtanh.f32 %v209_v24  ;;  %v1437_v26 = vmul.f32 -1.442695, %v209_v24 }
 0x159   :  { %1637 = vpow2.f32 %v1437_v26 }
 0x161   :  { %v1636_v25 = vpop.eup %1635 }
 0x162   :  { %243 = vrot.lane.b32.xlu0 %v1636_v25, %s1791_s2 }
 0x163   :  { %v1638_v27 = vpop.eup %1637 }
 0x164   :  { %v237_v28 = vadd.f32 1.0, %v1638_v27 }
 0x166   :  { %1639 = vrcp.f32 %v237_v28 }
 0x170   :  { %v1640_v29 = vpop.eup %1639 }
 0x171   :  { %v241_v32 = vmul.f32 0.0, %v1640_v29 }
 0x1d4   :  { %v244_v30 = vpop.permute.xlu0 %243 }
 0x1d5   :  { %v246_v31 = vmul.f32 %v1640_v29, %v244_v30 }
 0x1d7   :  { %248 = vrot.lane.b32.xlu1 %v246_v31, %s1792_s30 }
 0x249   :  { %v249_v33 = vpop.permute.xlu1 %248 }
 0x24a   :  { %v1880_v35 = vadd.f32 %v249_v33, %v241_v32 }
 0x24c   :  { %1641 = vtanh.f32 %v1880_v35 }
 0x24d   :  { %1643 = vtanh.f32 %v158_v36 }
 0x24e   :  { %1645 = vpow2.f32 %v1436_v39 }
 0x256   :  { %v1642_v37 = vpop.eup %1641 }
 0x257   :  { %254 = vrot.lane.b32.xlu1 %v1642_v37, %s1792_s30  ;;  %v1644_v38 = vpop.eup %1643 }
 0x258   :  { %v1646_v40 = vpop.eup %1645 }
 0x259   :  { %v213_v41 = vadd.f32 1.0, %v1646_v40 }
 0x25b   :  { %219 = vrot.lane.b32.xlu1 %v1644_v38, %s1791_s2  ;;  %1647 = vrcp.f32 %v213_v41 }
 0x265   :  { %v1648_v45 = vpop.eup %1647 }
 0x266   :  { %v217_v49 = vmul.f32 0.0, %v1648_v45 }
 0x2c9   :  { %v255_v42 = vpop.permute.xlu1 %254 }
 0x2ca   :  { %v1885_v43 = vmul.f32 %v1640_v29, %v255_v42 }
 0x2cc   :  { %v323_v44 = vpack.c.bf16 %v1885_v43, %v1885_v43 }
 0x2cd   :  { %v220_v46 = vpop.permute.xlu1 %219 }
 0x2ce   :  { %v222_v47 = vmul.f32 %v1648_v45, %v220_v46  ;;  %325 = vrot.lane.b32.xlu0 %v323_v44, %s1793_s7  ;;  %v438_v44 = vld [vmem:[#allocation2 + $0xa] sm:$0x3] }
 0x2d0   :  { %224 = vrot.lane.b32.xlu1 %v222_v47, %s1792_s30 }
 0x340   :  { %v326_v48 = vpop.permute.xlu0 %325 }
 0x341   :  { %1544 = vmatmul.mubr.msk.bf16.vlgmr.msra.gmra.mrb[8].mxu1 %vm114_vm2, %v326_v48 }
 0x342   :  { %v225_v50 = vpop.permute.xlu1 %224  ;;  %1554 = vmatpush3.bf16.msra.mxu1 %v1853_v4  ;;  %1555 = vmatprep.mubr.msk.bf16.mxu1 %vm1788_vm0, %v1787_v1 }
 0x343   :  { %v1895_v51 = vadd.f32 %v225_v50, %v217_v49  ;;  %1565 = vmatprep.subr.bf16.mxu1 %v1787_v1 }
 0x345   :  { %1649 = vtanh.f32 %v1895_v51 }
 0x34f   :  { %v1650_v52 = vpop.eup %1649 }
 0x350   :  { %230 = vrot.lane.b32.xlu1 %v1650_v52, %s1792_s30 }
 0x3c2   :  { %v231_v53 = vpop.permute.xlu1 %230 }
 0x3c3   :  { %v1900_v54 = vmul.f32 %v1648_v45, %v231_v53 }
 0x3c5   :  { %v275_v55 = vpack.c.bf16 %v1900_v54, %v1900_v54 }
 0x3c7   :  { %277 = vrot.lane.b32.xlu1 %v275_v55, %s1794_s8 }
 0x414   :  { %v364_v56 = vpop.f32.mrb[8].mxu1 }
 0x415   :  { %371 = vrot.lane.b32.xlu0 %v364_v56, %s1790_s4  ;;  %v1545_v57 = vpop.f32.mrb[9].mxu1 }
 0x416   :  { %v367_v58 = vpop.f32.mrb[10].mxu1 }
 0x417   :  { %v1546_v59 = vpop.f32.mrb[11].mxu1 }
 0x439   :  { %v278_v60 = vpop.permute.xlu1 %277 }
 0x43a   :  { %1538 = vmatmul.mubr.msk.bf16.vlgmr.msra.gmra.mrb[4].mxu0 %vm114_vm2, %v278_v60 }
 0x43b   :  { %1548 = vmatpush3.bf16.msra.mxu0 %v1841_v2  ;;  %1549 = vmatprep.mubr.msk.bf16.mxu0 %vm1788_vm0, %v1787_v1 }
 0x43c   :  { %1559 = vmatprep.subr.bf16.mxu0 %v1787_v1 }
 0x487   :  { %v372_v62 = vpop.permute.xlu0 %371 }
 0x488   :  { %v374_v63 = vadd.f32 %v372_v62, %v274_v61  ;;  %v436_v62 = vld [vmem:[#allocation2 + $0x4] sm:$0x3] }
 0x48a   :  { %1651 = vtanh.f32 %v374_v63  ;;  %v1442_v3 = vmul.f32 -1.442695, %v374_v63 }
 0x48c   :  { %1653 = vpow2.f32 %v1442_v3 }
 0x494   :  { %v1652_v0 = vpop.eup %1651 }
 0x495   :  { %408 = vrot.lane.b32.xlu0 %v1652_v0, %s1791_s2 }
 0x496   :  { %v1654_v5 = vpop.eup %1653 }
 0x497   :  { %v402_v6 = vadd.f32 1.0, %v1654_v5 }
 0x499   :  { %1655 = vrcp.f32 %v402_v6 }
 0x4a3   :  { %v1656_v7 = vpop.eup %1655 }
 0x4a4   :  { %v406_v14 = vmul.f32 %v1656_v7, %v1880_v35 }
 0x507   :  { %v409_v8 = vpop.permute.xlu0 %408 }
 0x508   :  { %v411_v9 = vmul.f32 %v1656_v7, %v409_v8 }
 0x50a   :  { %413 = vrot.lane.b32.xlu0 %v411_v9, %s1792_s30 }
 0x50d   :  { %v316_v10 = vpop.f32.mrb[4].mxu0 }
 0x50e   :  { %v1539_v11 = vpop.f32.mrb[5].mxu0  ;;  %v322_v18 = vadd.f32 %v316_v10, %v272_v17 }
 0x50f   :  { %v319_v12 = vpop.f32.mrb[6].mxu0 }
 0x510   :  { %v1540_v13 = vpop.f32.mrb[7].mxu0  ;;  %v1441_v21 = vmul.f32 -1.442695, %v322_v18 }
 0x57c   :  { %v414_v15 = vpop.permute.xlu0 %413 }
 0x57d   :  { %v1914_v16 = vadd.f32 %v414_v15, %v406_v14 }
 0x57f   :  { %1657 = vtanh.f32 %v1914_v16 }
 0x580   :  { %1659 = vtanh.f32 %v322_v18 }
 0x581   :  { %1661 = vpow2.f32 %v1441_v21 }
 0x589   :  { %v1658_v19 = vpop.eup %1657 }
 0x58a   :  { %419 = vrot.lane.b32.xlu0 %v1658_v19, %s1792_s30  ;;  %v1660_v20 = vpop.eup %1659 }
 0x58b   :  { %v1662_v22 = vpop.eup %1661 }
 0x58c   :  { %v378_v23 = vadd.f32 1.0, %v1662_v22 }
 0x58e   :  { %384 = vrot.lane.b32.xlu0 %v1660_v20, %s1791_s2  ;;  %1663 = vrcp.f32 %v378_v23 }
 0x598   :  { %v1664_v28 = vpop.eup %1663 }
 0x599   :  { %v382_v31 = vmul.f32 %v1664_v28, %v1895_v51 }
 0x5fc   :  { %v420_v24 = vpop.permute.xlu0 %419 }
 0x5fd   :  { %v1919_v25 = vmul.f32 %v1656_v7, %v420_v24 }
 0x5ff   :  { %v487_v26 = vpack.c.bf16 %v1919_v25, %v1919_v25 }
 0x600   :  { %v385_v27 = vpop.permute.xlu0 %384 }
 0x601   :  { %489 = vrot.lane.b32.xlu1 %v487_v26, %s1793_s7  ;;  %v387_v29 = vmul.f32 %v1664_v28, %v385_v27 }
 0x605   :  { %389 = vrot.lane.b32.xlu1 %v387_v29, %s1792_s30 }
 0x673   :  { %v490_v30 = vpop.permute.xlu1 %489 }
 0x674   :  { %1556 = vmatmul.mubr.msk.bf16.vlgmr.msra.gmra.mrb[12].mxu1 %vm114_vm2, %v490_v30 }
 0x675   :  { %1566 = vmatpush3.bf16.msra.mxu1 %v1853_v4  ;;  %1567 = vmatprep.mubr.msk.bf16.mxu1 %vm1788_vm0, %v1787_v1 }
 0x676   :  { %1577 = vmatprep.subr.bf16.mxu1 %v1787_v1 }
 0x677   :  { %v390_v32 = vpop.permute.xlu1 %389 }
 0x678   :  { %v1931_v33 = vadd.f32 %v390_v32, %v382_v31 }
 0x67a   :  { %1665 = vtanh.f32 %v1931_v33 }
 0x684   :  { %v1666_v34 = vpop.eup %1665 }
 0x685   :  { %395 = vrot.lane.b32.xlu1 %v1666_v34, %s1792_s30 }
 0x6f7   :  { %v396_v35 = vpop.permute.xlu1 %395 }
 0x6f8   :  { %v1935_v36 = vmul.f32 %v1664_v28, %v396_v35  ;;  %v602_v28 = vld [vmem:[#allocation2 + $0x8] sm:$0x3] }
 0x6fa   :  { %v439_v37 = vpack.c.bf16 %v1935_v36, %v1935_v36 }
 0x6fc   :  { %441 = vrot.lane.b32.xlu1 %v439_v37, %s1794_s8 }
 0x747   :  { %v528_v38 = vpop.f32.mrb[12].mxu1 }
 0x748   :  { %v1557_v39 = vpop.f32.mrb[13].mxu1  ;;  %535 = vrot.lane.b32.xlu0 %v528_v38, %s1790_s4 }
 0x749   :  { %v531_v40 = vpop.f32.mrb[14].mxu1 }
 0x74a   :  { %v1558_v41 = vpop.f32.mrb[15].mxu1 }
 0x76e   :  { %v442_v42 = vpop.permute.xlu1 %441 }
 0x76f   :  { %1550 = vmatmul.mubr.msk.bf16.vlgmr.msra.gmra.mrb[8].mxu0 %vm114_vm2, %v442_v42 }
 0x770   :  { %1560 = vmatpush3.bf16.msra.mxu0 %v1841_v2  ;;  %1561 = vmatprep.mubr.msk.bf16.mxu0 %vm1788_vm0, %v1787_v1 }
 0x771   :  { %1571 = vmatprep.subr.bf16.mxu0 %v1787_v1 }
 0x7ba   :  { %v536_v45 = vpop.permute.xlu0 %535 }
 0x7bb   :  { %v538_v46 = vadd.f32 %v536_v45, %v438_v44 }
 0x7bd   :  { %1667 = vtanh.f32 %v538_v46  ;;  %v1448_v48 = vmul.f32 -1.442695, %v538_v46 }
 0x7bf   :  { %1669 = vpow2.f32 %v1448_v48 }
 0x7c7   :  { %v1668_v47 = vpop.eup %1667 }
 0x7c8   :  { %572 = vrot.lane.b32.xlu0 %v1668_v47, %s1791_s2  ;;  %v600_v47 = vld [vmem:[#allocation2 + $0x6] sm:$0x3] }
 0x7c9   :  { %v1670_v49 = vpop.eup %1669 }
 0x7ca   :  { %v566_v50 = vadd.f32 1.0, %v1670_v49 }
 0x7cc   :  { %1671 = vrcp.f32 %v566_v50 }
 0x7d6   :  { %v1672_v51 = vpop.eup %1671 }
 0x7d7   :  { %v570_v59 = vmul.f32 %v1672_v51, %v1914_v16 }
 0x83a   :  { %v573_v52 = vpop.permute.xlu0 %572 }
 0x83b   :  { %v575_v53 = vmul.f32 %v1672_v51, %v573_v52 }
 0x83d   :  { %577 = vrot.lane.b32.xlu0 %v575_v53, %s1792_s30 }
 0x842   :  { %v480_v55 = vpop.f32.mrb[8].mxu0 }
 0x843   :  { %v1551_v56 = vpop.f32.mrb[9].mxu0  ;;  %v486_v63 = vadd.f32 %v480_v55, %v436_v62 }
 0x844   :  { %v483_v57 = vpop.f32.mrb[10].mxu0 }
 0x845   :  { %v1552_v58 = vpop.f32.mrb[11].mxu0  ;;  %v1447_v5 = vmul.f32 -1.442695, %v486_v63 }
 0x8af   :  { %v578_v60 = vpop.permute.xlu0 %577 }
 0x8b0   :  { %v1949_v61 = vadd.f32 %v578_v60, %v570_v59 }
 0x8b2   :  { %1673 = vtanh.f32 %v1949_v61 }
 0x8b3   :  { %1675 = vtanh.f32 %v486_v63 }
 0x8b4   :  { %1677 = vpow2.f32 %v1447_v5 }
 0x8bc   :  { %v1674_v0 = vpop.eup %1673 }
 0x8bd   :  { %583 = vrot.lane.b32.xlu1 %v1674_v0, %s1792_s30  ;;  %v1676_v3 = vpop.eup %1675 }
 0x8be   :  { %v1678_v6 = vpop.eup %1677 }
 0x8bf   :  { %v542_v7 = vadd.f32 1.0, %v1678_v6 }
 0x8c1   :  { %548 = vrot.lane.b32.xlu1 %v1676_v3, %s1791_s2  ;;  %1679 = vrcp.f32 %v542_v7 }
 0x8cb   :  { %v1680_v12 = vpop.eup %1679 }
 0x8cc   :  { %v546_v15 = vmul.f32 %v1680_v12, %v1931_v33 }
 0x92f   :  { %v584_v8 = vpop.permute.xlu1 %583 }
 0x930   :  { %v1954_v9 = vmul.f32 %v1672_v51, %v584_v8 }
 0x932   :  { %v651_v10 = vpack.c.bf16 %v1954_v9, %v1954_v9 }
 0x933   :  { %v549_v11 = vpop.permute.xlu1 %548 }
 0x934   :  { %653 = vrot.lane.b32.xlu0 %v651_v10, %s1793_s7  ;;  %v551_v13 = vmul.f32 %v1680_v12, %v549_v11 }
 0x938   :  { %553 = vrot.lane.b32.xlu0 %v551_v13, %s1792_s30 }
 0x9a6   :  { %v654_v14 = vpop.permute.xlu0 %653 }
 0x9a7   :  { %1568 = vmatmul.mubr.msk.bf16.vlgmr.msra.gmra.mrb[16].mxu1 %vm114_vm2, %v654_v14  ;;  %v764_v14 = vld [vmem:[#allocation2 + $0x6] sm:$0x3] }
 0x9a8   :  { %1578 = vmatpush3.bf16.msra.mxu1 %v1853_v4  ;;  %1579 = vmatprep.mubr.msk.bf16.mxu1 %vm1788_vm0, %v1787_v1 }
 0x9a9   :  { %1589 = vmatprep.subr.bf16.mxu1 %v1787_v1 }
 0x9aa   :  { %v554_v16 = vpop.permute.xlu0 %553 }
 0x9ab   :  { %v1966_v17 = vadd.f32 %v554_v16, %v546_v15 }
 0x9ad   :  { %1681 = vtanh.f32 %v1966_v17 }
 0x9b7   :  { %v1682_v18 = vpop.eup %1681 }
 0x9b8   :  { %559 = vrot.lane.b32.xlu1 %v1682_v18, %s1792_s30 }
 0xa2a   :  { %v560_v19 = vpop.permute.xlu1 %559 }
 0xa2b   :  { %v1970_v20 = vmul.f32 %v1680_v12, %v560_v19 }
 0xa2d   :  { %v603_v21 = vpack.c.bf16 %v1970_v20, %v1970_v20 }
 0xa2f   :  { %605 = vrot.lane.b32.xlu1 %v603_v21, %s1794_s8 }
 0xa7a   :  { %v692_v22 = vpop.f32.mrb[16].mxu1 }
 0xa7b   :  { %v1569_v23 = vpop.f32.mrb[17].mxu1  ;;  %699 = vrot.lane.b32.xlu0 %v692_v22, %s1790_s4 }
 0xa7c   :  { %v695_v24 = vpop.f32.mrb[18].mxu1 }
 0xa7d   :  { %v1570_v26 = vpop.f32.mrb[19].mxu1 }
 0xa7e   :  { %v763_v26 = vld [vmem:[#allocation2 + $0x8] sm:$0x3] }
 0xaa1   :  { %v606_v27 = vpop.permute.xlu1 %605 }
 0xaa2   :  { %1562 = vmatmul.mubr.msk.bf16.vlgmr.msra.gmra.mrb[12].mxu0 %vm114_vm2, %v606_v27 }
 0xaa3   :  { %1572 = vmatpush3.bf16.msra.mxu0 %v1841_v2  ;;  %1573 = vmatprep.mubr.msk.bf16.mxu0 %vm1788_vm0, %v1787_v1 }
 0xaa4   :  { %1583 = vmatprep.subr.bf16.mxu0 %v1787_v1 }
 0xaed   :  { %v700_v29 = vpop.permute.xlu0 %699 }
 0xaee   :  { %v702_v30 = vadd.f32 %v700_v29, %v602_v28 }
 0xaf0   :  { %1683 = vtanh.f32 %v702_v30  ;;  %v1454_v32 = vmul.f32 -1.442695, %v702_v30 }
 0xaf2   :  { %1685 = vpow2.f32 %v1454_v32 }
 0xafa   :  { %v1684_v31 = vpop.eup %1683 }
 0xafb   :  { %736 = vrot.lane.b32.xlu0 %v1684_v31, %s1791_s2 }
 0xafc   :  { %v1686_v33 = vpop.eup %1685 }
 0xafd   :  { %v730_v34 = vadd.f32 1.0, %v1686_v33 }
 0xaff   :  { %1687 = vrcp.f32 %v730_v34 }
 0xb09   :  { %v1688_v35 = vpop.eup %1687 }
 0xb0a   :  { %v734_v44 = vmul.f32 %v1688_v35, %v1949_v61 }
 0xb6d   :  { %v737_v37 = vpop.permute.xlu0 %736 }
 0xb6e   :  { %v739_v38 = vmul.f32 %v1688_v35, %v737_v37 }
 0xb70   :  { %741 = vrot.lane.b32.xlu1 %v739_v38, %s1792_s30 }
 0xb75   :  { %v644_v39 = vpop.f32.mrb[12].mxu0 }
 0xb76   :  { %v1563_v40 = vpop.f32.mrb[13].mxu0  ;;  %v650_v48 = vadd.f32 %v644_v39, %v600_v47 }
 0xb77   :  { %v647_v41 = vpop.f32.mrb[14].mxu0 }
 0xb78   :  { %v1564_v42 = vpop.f32.mrb[15].mxu0  ;;  %v1453_v51 = vmul.f32 -1.442695, %v650_v48 }
 0xbe2   :  { %v742_v45 = vpop.permute.xlu1 %741 }
 0xbe3   :  { %v1984_v46 = vadd.f32 %v742_v45, %v734_v44 }
 0xbe5   :  { %1689 = vtanh.f32 %v1984_v46 }
 0xbe6   :  { %1691 = vtanh.f32 %v650_v48 }
 0xbe7   :  { %1693 = vpow2.f32 %v1453_v51 }
 0xbef   :  { %v1690_v49 = vpop.eup %1689 }
 0xbf0   :  { %747 = vrot.lane.b32.xlu0 %v1690_v49, %s1792_s30  ;;  %v1692_v50 = vpop.eup %1691 }
 0xbf1   :  { %v1694_v52 = vpop.eup %1693 }
 0xbf2   :  { %v706_v53 = vadd.f32 1.0, %v1694_v52 }
 0xbf4   :  { %712 = vrot.lane.b32.xlu0 %v1692_v50, %s1791_s2  ;;  %1695 = vrcp.f32 %v706_v53 }
 0xbfe   :  { %v1696_v59 = vpop.eup %1695 }
 0xbff   :  { %v710_v62 = vmul.f32 %v1696_v59, %v1966_v17 }
 0xc62   :  { %v748_v55 = vpop.permute.xlu0 %747 }
 0xc63   :  { %v1989_v56 = vmul.f32 %v1688_v35, %v748_v55 }
 0xc65   :  { %v813_v57 = vpack.c.bf16 %v1989_v56, %v1989_v56 }
 0xc66   :  { %v713_v58 = vpop.permute.xlu0 %712 }
 0xc67   :  { %815 = vrot.lane.b32.xlu1 %v813_v57, %s1793_s7  ;;  %v715_v60 = vmul.f32 %v1696_v59, %v713_v58 }
 0xc6b   :  { %717 = vrot.lane.b32.xlu1 %v715_v60, %s1792_s30 }
 0xcd9   :  { %v816_v61 = vpop.permute.xlu1 %815 }
 0xcda   :  { %1580 = vmatmul.mubr.msk.bf16.vlgmr.msra.gmra.mrb[20].mxu1 %vm114_vm2, %v816_v61 }
 0xcdb   :  { %1590 = vmatpush3.bf16.msra.mxu1 %v1853_v4  ;;  %1591 = vmatprep.mubr.msk.bf16.mxu1 %vm1788_vm0, %v1787_v1 }
 0xcdc   :  { %1601 = vmatprep.subr.bf16.mxu1 %v1787_v1 }
 0xcdd   :  { %v718_v63 = vpop.permute.xlu1 %717 }
 0xcde   :  { %v720_v0 = vadd.f32 %v718_v63, %v710_v62  ;;  %v924_v63 = vld [vmem:[#allocation2 + $0x4] sm:$0x3] }
 0xce0   :  { %1697 = vtanh.f32 %v720_v0 }
 0xcea   :  { %v1698_v3 = vpop.eup %1697 }
 0xceb   :  { %723 = vrot.lane.b32.xlu0 %v1698_v3, %s1792_s30 }
 0xd5d   :  { %v724_v5 = vpop.permute.xlu0 %723 }
 0xd5e   :  { %v2002_v6 = vmul.f32 %v1696_v59, %v724_v5 }
 0xd60   :  { %v765_v7 = vpack.c.bf16 %v2002_v6, %v2002_v6 }
 0xd62   :  { %767 = vrot.lane.b32.xlu1 %v765_v7, %s1794_s8  ;;  %v923_v7 = vld [vmem:[#allocation2 + $0xa] sm:$0x3] }
 0xdad   :  { %v854_v8 = vpop.f32.mrb[20].mxu1 }
 0xdae   :  { %v1581_v10 = vpop.f32.mrb[21].mxu1  ;;  %861 = vrot.lane.b32.xlu0 %v854_v8, %s1790_s4 }
 0xdaf   :  { %v857_v11 = vpop.f32.mrb[22].mxu1 }
 0xdb0   :  { %v1582_v12 = vpop.f32.mrb[23].mxu1 }
 0xdd4   :  { %v768_v13 = vpop.permute.xlu1 %767 }
 0xdd5   :  { %1574 = vmatmul.mubr.msk.bf16.vlgmr.msra.gmra.mrb[16].mxu0 %vm114_vm2, %v768_v13 }
 0xdd6   :  { %1584 = vmatpush3.bf16.msra.mxu0 %v1841_v2  ;;  %1585 = vmatprep.mubr.msk.bf16.mxu0 %vm1788_vm0, %v1787_v1 }
 0xdd7   :  { %1595 = vmatprep.subr.bf16.mxu0 %v1787_v1 }
 0xe20   :  { %v862_v15 = vpop.permute.xlu0 %861 }
 0xe21   :  { %v864_v16 = vadd.f32 %v862_v15, %v764_v14 }
 0xe23   :  { %1699 = vtanh.f32 %v864_v16  ;;  %v1460_v18 = vmul.f32 -1.442695, %v864_v16 }
 0xe25   :  { %1701 = vpow2.f32 %v1460_v18 }
 0xe2d   :  { %v1700_v17 = vpop.eup %1699 }
 0xe2e   :  { %898 = vrot.lane.b32.xlu1 %v1700_v17, %s1791_s2 }
 0xe2f   :  { %v1702_v19 = vpop.eup %1701 }
 0xe30   :  { %v892_v21 = vadd.f32 1.0, %v1702_v19 }
 0xe32   :  { %1703 = vrcp.f32 %v892_v21 }
 0xe3c   :  { %v1704_v22 = vpop.eup %1703 }
 0xe3d   :  { %v896_v34 = vmul.f32 %v1704_v22, %v1984_v46 }
 0xea0   :  { %v899_v23 = vpop.permute.xlu1 %898 }
 0xea1   :  { %v901_v24 = vmul.f32 %v1704_v22, %v899_v23 }
 0xea3   :  { %903 = vrot.lane.b32.xlu0 %v901_v24, %s1792_s30 }
 0xea8   :  { %v806_v27 = vpop.f32.mrb[16].mxu0 }
 0xea9   :  { %v812_v28 = vadd.f32 %v806_v27, %v763_v26  ;;  %v1575_v29 = vpop.f32.mrb[17].mxu0 }
 0xeaa   :  { %v809_v30 = vpop.f32.mrb[18].mxu0 }
 0xeab   :  { %1705 = vtanh.f32 %v812_v28  ;;  %v1576_v31 = vpop.f32.mrb[19].mxu0  ;;  %v1459_v33 = vmul.f32 -1.442695, %v812_v28 }
 0xead   :  { %1707 = vpow2.f32 %v1459_v33 }
 0xeb5   :  { %v1706_v32 = vpop.eup %1705 }
 0xeb6   :  { %874 = vrot.lane.b32.xlu0 %v1706_v32, %s1791_s2 }
 0xeb7   :  { %v1708_v38 = vpop.eup %1707 }
 0xeb8   :  { %v868_v39 = vadd.f32 1.0, %v1708_v38 }
 0xf15   :  { %v904_v35 = vpop.permute.xlu0 %903 }
 0xf16   :  { %v2017_v37 = vadd.f32 %v904_v35, %v896_v34 }
 0xf18   :  { %1709 = vtanh.f32 %v2017_v37 }
 0xf19   :  { %1711 = vrcp.f32 %v868_v39 }
 0xf22   :  { %v1710_v40 = vpop.eup %1709 }
 0xf23   :  { %909 = vrot.lane.b32.xlu1 %v1710_v40, %s1792_s30  ;;  %v1712_v41 = vpop.eup %1711 }
 0xf24   :  { %v872_v48 = vmul.f32 %v1712_v41, %v720_v0 }
 0xf28   :  { %v875_v42 = vpop.permute.xlu0 %874 }
 0xf29   :  { %v877_v44 = vmul.f32 %v1712_v41, %v875_v42 }
 0xf2b   :  { %879 = vrot.lane.b32.xlu0 %v877_v44, %s1792_s30 }
 0xf95   :  { %v910_v45 = vpop.permute.xlu1 %909 }
 0xf96   :  { %v2022_v47 = vmul.f32 %v1704_v22, %v910_v45 }
 0xf98   :  { %v973_v46 = vpack.c.bf16 %v2022_v47, %v2022_v47 }
 0xf9a   :  { %975 = vrot.lane.b32.xlu1 %v973_v46, %s1793_s7 }
 0xf9d   :  { %v880_v49 = vpop.permute.xlu0 %879 }
 0xf9e   :  { %v882_v50 = vadd.f32 %v880_v49, %v872_v48 }
 0xfa0   :  { %1713 = vtanh.f32 %v882_v50 }
 0xfaa   :  { %v1714_v51 = vpop.eup %1713 }
 0xfab   :  { %885 = vrot.lane.b32.xlu1 %v1714_v51, %s1792_s30 }
0x100c   :  { %v976_v52 = vpop.permute.xlu1 %975 }
0x100d   :  { %1592 = vmatmul.mubr.msk.bf16.vlgmr.msra.gmra.mrb[24].mxu1 %vm114_vm2, %v976_v52  ;;  %v1083_v52 = vld [vmem:[#allocation2 + $0xc] sm:$0x3] }
0x100e   :  { %1602 = vmatpush3.bf16.msra.mxu1 %v1853_v4  ;;  %1603 = vmatprep.mubr.msk.bf16.mxu1 %vm1788_vm0, %v1787_v1 }
0x100f   :  { %1613 = vmatprep.subr.bf16.mxu1 %v1787_v1 }
0x101d   :  { %v886_v53 = vpop.permute.xlu1 %885 }
0x101e   :  { %v2033_v55 = vmul.f32 %v1712_v41, %v886_v53 }
0x1020   :  { %v925_v57 = vpack.c.bf16 %v2033_v55, %v2033_v55 }
0x1022   :  { %927 = vrot.lane.b32.xlu0 %v925_v57, %s1794_s8 }
0x1094   :  { %v928_v58 = vpop.permute.xlu0 %927 }
0x1095   :  { %1586 = vmatmul.mubr.msk.bf16.vlgmr.msra.gmra.mrb[20].mxu0 %vm114_vm2, %v928_v58 }
0x1096   :  { %1596 = vmatpush3.bf16.msra.mxu0 %v1841_v2  ;;  %1597 = vmatprep.mubr.msk.bf16.mxu0 %vm1788_vm0, %v1787_v1 }
0x1097   :  { %1607 = vmatprep.subr.bf16.mxu0 %v1787_v1 }
0x10e0   :  { %v1014_v59 = vpop.f32.mrb[24].mxu1 }
0x10e1   :  { %v1593_v60 = vpop.f32.mrb[25].mxu1  ;;  %1021 = vrot.lane.b32.xlu1 %v1014_v59, %s1790_s4 }
0x10e2   :  { %v1017_v61 = vpop.f32.mrb[26].mxu1 }
0x10e3   :  { %v1594_v62 = vpop.f32.mrb[27].mxu1 }
0x1153   :  { %v1022_v0 = vpop.permute.xlu1 %1021 }
0x1154   :  { %v1024_v3 = vadd.f32 %v1022_v0, %v924_v63 }
0x1156   :  { %1715 = vtanh.f32 %v1024_v3  ;;  %v1466_v15 = vmul.f32 -1.442695, %v1024_v3 }
0x1160   :  { %v1716_v5 = vpop.eup %1715 }
0x1161   :  { %1058 = vrot.lane.b32.xlu0 %v1716_v5, %s1791_s2 }
0x1168   :  { %v966_v8 = vpop.f32.mrb[20].mxu0 }
0x1169   :  { %v972_v10 = vadd.f32 %v966_v8, %v923_v7  ;;  %v1587_v11 = vpop.f32.mrb[21].mxu0 }
0x116a   :  { %v969_v12 = vpop.f32.mrb[22].mxu0 }
0x116b   :  { %1717 = vtanh.f32 %v972_v10  ;;  %v1588_v13 = vpop.f32.mrb[23].mxu0  ;;  %v1465_v18 = vmul.f32 -1.442695, %v972_v10 }
0x116c   :  { %1719 = vpow2.f32 %v1466_v15 }
0x1175   :  { %v1718_v14 = vpop.eup %1717 }
0x1176   :  { %1034 = vrot.lane.b32.xlu0 %v1718_v14, %s1791_s2  ;;  %v1720_v16 = vpop.eup %1719 }
0x1177   :  { %v1052_v17 = vadd.f32 1.0, %v1720_v16 }
0x1179   :  { %1721 = vrcp.f32 %v1052_v17 }
0x117a   :  { %1723 = vpow2.f32 %v1465_v18 }
0x1183   :  { %v1722_v19 = vpop.eup %1721 }
0x1184   :  { %v1724_v23 = vpop.eup %1723  ;;  %v1056_v29 = vmul.f32 %v1722_v19, %v2017_v37 }
0x1185   :  { %v1028_v24 = vadd.f32 1.0, %v1724_v23 }
0x1187   :  { %1725 = vrcp.f32 %v1028_v24 }
0x1191   :  { %v1726_v26 = vpop.eup %1725 }
0x1192   :  { %v1032_v33 = vmul.f32 %v1726_v26, %v882_v50 }
0x11d3   :  { %v1059_v21 = vpop.permute.xlu0 %1058 }
0x11d4   :  { %v1061_v22 = vmul.f32 %v1722_v19, %v1059_v21 }
0x11d6   :  { %1063 = vrot.lane.b32.xlu1 %v1061_v22, %s1792_s30 }
0x11e8   :  { %v1035_v27 = vpop.permute.xlu0 %1034 }
0x11e9   :  { %v1037_v28 = vmul.f32 %v1726_v26, %v1035_v27 }
0x11eb   :  { %1039 = vrot.lane.b32.xlu0 %v1037_v28, %s1792_s30 }
0x1248   :  { %v1064_v30 = vpop.permute.xlu1 %1063 }
0x1249   :  { %v2049_v31 = vadd.f32 %v1064_v30, %v1056_v29 }
0x124b   :  { %1727 = vtanh.f32 %v2049_v31 }
0x1255   :  { %v1728_v32 = vpop.eup %1727 }
0x1256   :  { %1069 = vrot.lane.b32.xlu1 %v1728_v32, %s1792_s30 }
0x125d   :  { %v1040_v34 = vpop.permute.xlu0 %1039 }
0x125e   :  { %v1042_v35 = vadd.f32 %v1040_v34, %v1032_v33  ;;  %v1243_v34 = vld [vmem:[#allocation2 + $0xe] sm:$0x3] }
0x1260   :  { %1729 = vtanh.f32 %v1042_v35 }
0x126a   :  { %v1730_v38 = vpop.eup %1729 }
0x126b   :  { %1045 = vrot.lane.b32.xlu0 %v1730_v38, %s1792_s30 }
0x12c8   :  { %v1070_v39 = vpop.permute.xlu1 %1069 }
0x12c9   :  { %v2054_v40 = vmul.f32 %v1722_v19, %v1070_v39 }
0x12cb   :  { %v1133_v37 = vpack.c.bf16 %v2054_v40, %v2054_v40 }
0x12cd   :  { %1135 = vrot.lane.b32.xlu1 %v1133_v37, %s1793_s7 }
0x12dd   :  { %v1046_v41 = vpop.permute.xlu0 %1045 }
0x12de   :  { %v2059_v42 = vmul.f32 %v1726_v26, %v1046_v41 }
0x12e0   :  { %v1085_v44 = vpack.c.bf16 %v2059_v42, %v2059_v42 }
0x12e2   :  { %1087 = vrot.lane.b32.xlu1 %v1085_v44, %s1794_s8 }
0x133f   :  { %v1136_v45 = vpop.permute.xlu1 %1135 }
0x1340   :  { %1604 = vmatmul.mubr.msk.bf16.vlgmr.msra.gmra.mrb[28].mxu1 %vm114_vm2, %v1136_v45 }
0x1341   :  { %1614 = vmatpush3.bf16.msra.mxu1 %v1853_v4  ;;  %1615 = vmatprep.mubr.msk.bf16.mxu1 %vm1788_vm0, %v1787_v1 }
0x1354   :  { %v1088_v46 = vpop.permute.xlu1 %1087 }
0x1355   :  { %1598 = vmatmul.mubr.msk.bf16.vlgmr.msra.gmra.mrb[24].mxu0 %vm114_vm2, %v1088_v46 }
0x1356   :  { %1608 = vmatpush3.bf16.msra.mxu0 %v1841_v2  ;;  %1609 = vmatprep.mubr.msk.bf16.mxu0 %vm1788_vm0, %v1787_v1  ;;  %v1084_v2 = vld [vmem:[#allocation2 + $0x2] sm:$0x3] }
0x1413   :  { %v1174_v48 = vpop.f32.mrb[28].mxu1 }
0x1414   :  { %v1605_v49 = vpop.f32.mrb[29].mxu1  ;;  %1181 = vrot.lane.b32.xlu0 %v1174_v48, %s1790_s4 }
0x1415   :  { %v1177_v50 = vpop.f32.mrb[30].mxu1 }
0x1416   :  { %v1606_v51 = vpop.f32.mrb[31].mxu1 }
0x1428   :  { %v1126_v53 = vpop.f32.mrb[24].mxu0 }
0x1429   :  { %v1132_v4 = vadd.f32 %v1126_v53, %v1083_v52  ;;  %v1599_v57 = vpop.f32.mrb[25].mxu0 }
0x142a   :  { %v1129_v58 = vpop.f32.mrb[26].mxu0 }
0x142b   :  { %1731 = vtanh.f32 %v1132_v4  ;;  %v1600_v59 = vpop.f32.mrb[27].mxu0  ;;  %v1471_v1 = vmul.f32 -1.442695, %v1132_v4  ;;  %v1244_v58 = vld [vmem:[#allocation2] sm:$0x3] }
0x1435   :  { %v1732_v60 = vpop.eup %1731 }
0x1436   :  { %1194 = vrot.lane.b32.xlu0 %v1732_v60, %s1791_s2 }
0x1486   :  { %v1182_v61 = vpop.permute.xlu0 %1181 }
0x1487   :  { %v1184_v62 = vadd.f32 %v1182_v61, %v1084_v2 }
0x1489   :  { %1733 = vtanh.f32 %v1184_v62  ;;  %v1472_v10 = vmul.f32 -1.442695, %v1184_v62 }
0x148a   :  { %1735 = vpow2.f32 %v1471_v1 }
0x1493   :  { %v1734_v63 = vpop.eup %1733 }
0x1494   :  { %1218 = vrot.lane.b32.xlu1 %v1734_v63, %s1791_s2  ;;  %v1736_v0 = vpop.eup %1735 }
0x1495   :  { %v1188_v3 = vadd.f32 1.0, %v1736_v0 }
0x1497   :  { %1737 = vrcp.f32 %v1188_v3 }
0x1498   :  { %1739 = vpow2.f32 %v1472_v10 }
0x14a1   :  { %v1738_v5 = vpop.eup %1737 }
0x14a2   :  { %v1740_v11 = vpop.eup %1739  ;;  %v1192_v16 = vmul.f32 %v1738_v5, %v1042_v35 }
0x14a3   :  { %v1212_v12 = vadd.f32 1.0, %v1740_v11 }
0x14a5   :  { %1741 = vrcp.f32 %v1212_v12 }
0x14a8   :  { %v1195_v7 = vpop.permute.xlu0 %1194 }
0x14a9   :  { %v1197_v8 = vmul.f32 %v1738_v5, %v1195_v7 }
0x14ab   :  { %1199 = vrot.lane.b32.xlu0 %v1197_v8, %s1792_s30 }
0x14af   :  { %v1742_v13 = vpop.eup %1741 }
0x14b0   :  { %v1216_v21 = vmul.f32 %v1742_v13, %v2049_v31 }
0x1506   :  { %v1219_v14 = vpop.permute.xlu1 %1218 }
0x1507   :  { %v1221_v15 = vmul.f32 %v1742_v13, %v1219_v14 }
0x1509   :  { %1223 = vrot.lane.b32.xlu1 %v1221_v15, %s1792_s30 }
0x151d   :  { %v1200_v17 = vpop.permute.xlu0 %1199 }
0x151e   :  { %v1202_v18 = vadd.f32 %v1200_v17, %v1192_v16 }
0x1520   :  { %1743 = vtanh.f32 %v1202_v18 }
0x152a   :  { %v1744_v19 = vpop.eup %1743 }
0x152b   :  { %1205 = vrot.lane.b32.xlu0 %v1744_v19, %s1792_s30 }
0x157b   :  { %v1224_v22 = vpop.permute.xlu1 %1223 }
0x157c   :  { %v2079_v23 = vadd.f32 %v1224_v22, %v1216_v21 }
0x157e   :  { %1745 = vtanh.f32 %v2079_v23 }
0x1588   :  { %v1746_v24 = vpop.eup %1745 }
0x1589   :  { %1229 = vrot.lane.b32.xlu1 %v1746_v24, %s1792_s30 }
0x159d   :  { %v1206_v26 = vpop.permute.xlu0 %1205 }
0x159e   :  { %v2083_v27 = vmul.f32 %v1738_v5, %v1206_v26 }
0x15a0   :  { %v1245_v28 = vpack.c.bf16 %v2083_v27, %v2083_v27 }
0x15a2   :  { %1247 = vrot.lane.b32.xlu0 %v1245_v28, %s1794_s8 }
0x15fb   :  { %v1230_v29 = vpop.permute.xlu1 %1229 }
0x15fc   :  { %v2088_v30 = vmul.f32 %v1742_v13, %v1230_v29 }
0x15fe   :  { %v1293_v31 = vpack.c.bf16 %v2088_v30, %v2088_v30 }
0x1600   :  { %1295 = vrot.lane.b32.xlu1 %v1293_v31, %s1793_s7 }
0x1614   :  { %v1248_v32 = vpop.permute.xlu0 %1247 }
0x1615   :  { %1610 = vmatmul.mubr.msk.bf16.vlgmr.msra.gmra.mrb[28].mxu0 %vm114_vm2, %v1248_v32 }
0x1672   :  { %v1296_v33 = vpop.permute.xlu1 %1295 }
0x1673   :  { %1616 = vmatmul.mubr.msk.bf16.vlgmr.msra.gmra.mrb[32].mxu1 %vm114_vm2, %v1296_v33 }
0x16e8   :  { %v1286_v35 = vpop.f32.mrb[28].mxu0 }
0x16e9   :  { %v1292_v38 = vadd.f32 %v1286_v35, %v1243_v34  ;;  %v1611_v39 = vpop.f32.mrb[29].mxu0 }
0x16ea   :  { %v1289_v37 = vpop.f32.mrb[30].mxu0 }
0x16eb   :  { %1747 = vtanh.f32 %v1292_v38  ;;  %v1612_v41 = vpop.f32.mrb[31].mxu0  ;;  %v1477_v49 = vmul.f32 -1.442695, %v1292_v38 }
0x16ed   :  { %1749 = vpow2.f32 %v1477_v49 }
0x16f5   :  { %v1748_v44 = vpop.eup %1747 }
0x16f6   :  { %1354 = vrot.lane.b32.xlu0 %v1748_v44, %s1791_s2 }
0x16f7   :  { %v1750_v51 = vpop.eup %1749 }
0x16f8   :  { %v1348_v52 = vadd.f32 1.0, %v1750_v51 }
0x16fa   :  { %1751 = vrcp.f32 %v1348_v52 }
0x1704   :  { %v1752_v53 = vpop.eup %1751 }
0x1705   :  { %v1352_v61 = vmul.f32 %v1752_v53, %v1202_v18 }
0x1746   :  { %v1334_v45 = vpop.f32.mrb[32].mxu1 }
0x1747   :  { %1341 = vrot.lane.b32.xlu1 %v1334_v45, %s1790_s4  ;;  %v1617_v46 = vpop.f32.mrb[33].mxu1 }
0x1748   :  { %v1337_v48 = vpop.f32.mrb[34].mxu1 }
0x1749   :  { %v1618_v50 = vpop.f32.mrb[35].mxu1 }
0x1768   :  { %v1355_v4 = vpop.permute.xlu0 %1354 }
0x1769   :  { %v1357_v57 = vmul.f32 %v1752_v53, %v1355_v4 }
0x176b   :  { %1359 = vrot.lane.b32.xlu0 %v1357_v57, %s1792_s30 }
0x17b9   :  { %v1342_v59 = vpop.permute.xlu1 %1341 }
0x17ba   :  { %v1344_v60 = vadd.f32 %v1342_v59, %v1244_v58 }
0x17bc   :  { %1753 = vtanh.f32 %v1344_v60  ;;  %v1478_v0 = vmul.f32 -1.442695, %v1344_v60 }
0x17c6   :  { %v1754_v2 = vpop.eup %1753 }
0x17c7   :  { %1378 = vrot.lane.b32.xlu1 %v1754_v2, %s1791_s2 }
0x17dd   :  { %v1360_v62 = vpop.permute.xlu0 %1359 }
0x17de   :  { %v1362_v1 = vadd.f32 %v1360_v62, %v1352_v61 }
0x17e0   :  { %1755 = vtanh.f32 %v1362_v1 }
0x17e1   :  { %1757 = vpow2.f32 %v1478_v0 }
0x17ea   :  { %v1756_v63 = vpop.eup %1755 }
0x17eb   :  { %1365 = vrot.lane.b32.xlu0 %v1756_v63, %s1792_s30  ;;  %v1758_v3 = vpop.eup %1757 }
0x17ec   :  { %v1372_v5 = vadd.f32 1.0, %v1758_v3 }
0x17ee   :  { %1759 = vrcp.f32 %v1372_v5 }
0x17ef   :  { %259 = vrot.lane.b32.xlu0 %v1900_v54, %s1794_s8 }
0x17f3   :  { %424 = vrot.lane.b32.xlu0 %v1935_v36, %s1794_s8 }
0x17f7   :  { %588 = vrot.lane.b32.xlu0 %v1970_v20, %s1794_s8 }
0x17f8   :  { %v1760_v7 = vpop.eup %1759 }
0x17fb   :  { %752 = vrot.lane.b32.xlu0 %v2002_v6, %s1794_s8 }
0x1839   :  { %v1379_v8 = vpop.permute.xlu1 %1378 }
0x183a   :  { %v1381_v10 = vmul.f32 %v1760_v7, %v1379_v8 }
0x183c   :  { %1383 = vrot.lane.b32.xlu1 %v1381_v10, %s1792_s30 }
0x185d   :  { %v1366_v54 = vpop.permute.xlu0 %1365 }
0x185e   :  { %v1368_v11 = vmul.f32 %v1752_v53, %v1366_v54 }
0x1860   :  { %1394 = vrot.lane.b32.xlu0 %v1368_v11, %s1794_s8 }
0x1861   :  { %v260_v36 = vpop.permute.xlu0 %259 }
0x1862   :  { %263 = vst.msk [vmem:[%s2211_s5] sm:$0x3] %vm262_vm3, %v260_v36 }
0x1864   :  { %914 = vrot.lane.b32.xlu0 %v2033_v55, %s1794_s8  ;;  %v1376_v55 = vmul.f32 %v1760_v7, %v2079_v23 }
0x1865   :  { %v425_v20 = vpop.permute.xlu0 %424 }
0x1866   :  { %1443 = vst.msk [vmem:[%s2211_s5 + $0x2] sm:$0x3] %vm262_vm3, %v425_v20 }
0x1868   :  { %1074 = vrot.lane.b32.xlu0 %v2059_v42, %s1794_s8 }
0x1869   :  { %v589_v6 = vpop.permute.xlu0 %588 }
0x186a   :  { %1449 = vst.msk [vmem:[%s2211_s5 + $0x4] sm:$0x3] %vm262_vm3, %v589_v6 }
0x186c   :  { %1234 = vrot.lane.b32.xlu0 %v2083_v27, %s1794_s8 }
0x186d   :  { %v753_v12 = vpop.permute.xlu0 %752 }
0x186e   :  { %1455 = vst.msk [vmem:[%s2211_s5 + $0x6] sm:$0x3] %vm262_vm3, %v753_v12 }
0x18ae   :  { %v1384_v13 = vpop.permute.xlu1 %1383 }
0x18af   :  { %v1386_v14 = vadd.f32 %v1384_v13, %v1376_v55 }
0x18b1   :  { %1761 = vtanh.f32 %v1386_v14 }
0x18bb   :  { %v1762_v42 = vpop.eup %1761 }
0x18bc   :  { %1389 = vrot.lane.b32.xlu1 %v1762_v42, %s1792_s30 }
0x18c0   :  { %265 = vrot.lane.b32.xlu1 %v1885_v43, %s1795_s17 }
0x18c4   :  { %430 = vrot.lane.b32.xlu1 %v1919_v25, %s1795_s17 }
0x18c8   :  { %594 = vrot.lane.b32.xlu1 %v1954_v9, %s1795_s17 }
0x18cc   :  { %758 = vrot.lane.b32.xlu1 %v1989_v56, %s1795_s17 }
0x18d0   :  { %919 = vrot.lane.b32.xlu1 %v2022_v47, %s1795_s17 }
0x18d2   :  { %v1395_v15 = vpop.permute.xlu0 %1394 }
0x18d3   :  { %1403 = vst.msk [vmem:[#allocation3] sm:$0x3] %vm262_vm3, %v1395_v15 }
0x18d4   :  { %1079 = vrot.lane.b32.xlu1 %v2054_v40, %s1795_s17 }
0x18d6   :  { %v915_v16 = vpop.permute.xlu0 %914 }
0x18da   :  { %v1075_v19 = vpop.permute.xlu0 %1074 }
0x18de   :  { %v1235_v9 = vpop.permute.xlu0 %1234 }
0x192e   :  { %v1390_v17 = vpop.permute.xlu1 %1389 }
0x192f   :  { %v1392_v18 = vmul.f32 %v1760_v7, %v1390_v17 }
0x1931   :  { %1404 = vrot.lane.b32.xlu1 %v1392_v18, %s1793_s7  ;;  %1399 = vrot.lane.b32.xlu0 %v1392_v18, %s1795_s17 }
0x1932   :  { %v266_v43 = vpop.permute.xlu1 %265 }
0x1933   :  { %1438 = vst.msk [vmem:[%s2211_s5 + $0xe] sm:$0x3] %vm269_vm4, %v266_v43 }
0x1934   :  { %1479 = vst.msk [vmem:[%s2211_s5 + $0xe] sm:$0x3] %vm262_vm3, %v1395_v15 }
0x1935   :  { %1239 = vrot.lane.b32.xlu1 %v2088_v30, %s1795_s17 }
0x1936   :  { %v431_v25 = vpop.permute.xlu1 %430 }
0x1937   :  { %1444 = vst.msk [vmem:[%s2211_s5 + $0xc] sm:$0x3] %vm269_vm4, %v431_v25 }
0x1938   :  { %1473 = vst.msk [vmem:[%s2211_s5 + $0xc] sm:$0x3] %vm262_vm3, %v1235_v9 }
0x193a   :  { %v595_v56 = vpop.permute.xlu1 %594 }
0x193b   :  { %1450 = vst.msk [vmem:[%s2211_s5 + $0xa] sm:$0x3] %vm269_vm4, %v595_v56 }
0x193c   :  { %1467 = vst.msk [vmem:[%s2211_s5 + $0xa] sm:$0x3] %vm262_vm3, %v1075_v19 }
0x193e   :  { %v759_v47 = vpop.permute.xlu1 %758 }
0x193f   :  { %1456 = vst.msk [vmem:[%s2211_s5 + $0x8] sm:$0x3] %vm269_vm4, %v759_v47 }
0x1940   :  { %1461 = vst.msk [vmem:[%s2211_s5 + $0x8] sm:$0x3] %vm262_vm3, %v915_v16 }
0x1942   :  { %v920_v40 = vpop.permute.xlu1 %919 }
0x1943   :  { %1462 = vst.msk [vmem:[%s2211_s5 + $0x6] sm:$0x3] %vm269_vm4, %v920_v40 }
0x1946   :  { %v1080_v21 = vpop.permute.xlu1 %1079 }
0x1947   :  { %1468 = vst.msk [vmem:[%s2211_s5 + $0x4] sm:$0x3] %vm269_vm4, %v1080_v21 }
0x19a3   :  { %v1405_v22 = vpop.permute.xlu1 %1404  ;;  %v1400_v23 = vpop.permute.xlu0 %1399 }
0x19a4   :  { %1408 = vst.msk [vmem:[#allocation3 + $0x2] sm:$0x3] %vm262_vm3, %v1405_v22 }
0x19a5   :  { %1402 = vst.msk [vmem:[%s2211_s5] sm:$0x3] %vm269_vm4, %v1400_v23 }
0x19a6   :  { %1774 = shalt.err (!%p1771_p4)
}
0x19a7   :  { %s1775_s17 = scalar_lea.hbm %s2212_s6, 64 }
0x19a8   :  { %p1776_p5 = scmp.ne.s32.totalorder %s2212_s6, %s1775_s17  ;;  %p1779_p6 = scmp.lt.u32.totalorder %s1775_s17, %s2212_s6 }
0x19aa   :  { %p1781_p7 = pnand %p1779_p6, %p1776_p5 }
0x19ac   :  { %1784 = shalt.err (!%p1781_p7)
}
0x19ad   :  { %s1797_s22 = smov 2   ;;  %v1240_v24 = vpop.permute.xlu1 %1239 }
0x19ae   :  { %1422 = dma.vmem_to_hbm [thread:$0]  %s1417_s11, 64, %s2212_s6, [#allocation4], %s1793_s7, %s1793_s7, %s1797_s22  }
0x19af   :  { %1474 = vst.msk [vmem:[%s2211_s5 + $0x2] sm:$0x3] %vm269_vm4, %v1240_v24 }
0x19b0   :  { %1785 = dma.done.wait [#allocation4], 64  }
0x19b1   :  { %1786 = vsyncadd [#allocation4], 4294967232 }
0x19b2   :  { %1428 = vsyncpa [#allocation4], 1 }

</bundles_post_ra>
